<compile_context>
chip_gen: v5e
topology: v5e:2x2
jax: 0.10.0
libtpu: 0.0.40
codegen_flags: <defaults>
</compile_context>

<pallas_src>
import jax
import jax.numpy as jnp
from jax.experimental import pallas as pl
from jax.experimental.pallas import tpu as pltpu


def _bn_add_conv_kernel(x_ref, r_ref, scale_ref, shift_ref, w_ref, o_ref):
    # x_ref, r_ref : (Cin, T)    channels on sublanes, spatial tile on lanes
    # scale_ref    : (Cin, 1)    gamma * rsqrt(var + eps)
    # shift_ref    : (Cin, 1)    beta - mean * scale
    # w_ref        : (Cout, Cin) raw 1x1 conv weight
    # o_ref        : (Cout, T)
    x = x_ref[...].astype(jnp.float32)
    r = r_ref[...].astype(jnp.float32)
    # BN + residual folded into the activation on the VPU (hidden under DMA).
    tmp = x * scale_ref[...] + shift_ref[...] + r
    # Single MXU matmul, f32 accumulate.
    acc = jnp.dot(w_ref[...], tmp.astype(w_ref.dtype),
                  preferred_element_type=jnp.float32)
    o_ref[...] = acc.astype(o_ref.dtype)


def bn_add_conv1x1(x128, x115, weight, gamma, beta, eps=1e-5, tile_hw=1152):
    """x128, x115: (N, Cin, H, W); weight: (Cout, Cin, 1, 1) -> (N, Cout, H, W)."""
    N, Cin, H, W = x128.shape
    Cout = weight.shape[0]
    HW = H * W

    # ---- Pass 1: single-read global training-mode BN statistics -------------
    # var = E[x^2] - E[x]^2 (one fused reduction over x128; f32 accumulate).
    xf = x128.astype(jnp.float32).reshape(N, Cin, HW)
    cnt = jnp.float32(N * HW)
    s1 = jnp.sum(xf, axis=(0, 2))
    s2 = jnp.sum(xf * xf, axis=(0, 2))
    mean = s1 / cnt                                                   # (Cin,)
    var = jnp.maximum(s2 / cnt - mean * mean, 0.0)                    # biased var
    inv_std = jax.lax.rsqrt(var + eps)

    # ---- Fold the BN affine into per-channel scale/shift vectors ------------
    scale = (gamma.astype(jnp.float32) * inv_std).reshape(Cin, 1)     # (Cin, 1)
    shift = (beta.astype(jnp.float32).reshape(Cin, 1)
             - mean.reshape(Cin, 1) * scale)                          # (Cin, 1)
    w_mat = weight.reshape(Cout, Cin).astype(jnp.float32)             # (Cout, Cin)

    # NCHW -> (N, Cin, H*W): contiguous reshape, no transpose / HBM shuffle.
    x_rows = x128.reshape(N, Cin, HW)
    r_rows = x115.reshape(N, Cin, HW)

    # Coarse spatial tiling: fewer, fatter grid steps (per-step overhead
    # ~0.35 us). t must be a 128-multiple or the full HW extent.
    t = min(tile_hw, HW)
    grid = (N, pl.cdiv(HW, t))

    out_dtype = x128.dtype
    out = pl.pallas_call(
        _bn_add_conv_kernel,
        out_shape=jax.ShapeDtypeStruct((N, Cout, HW), out_dtype),
        grid=grid,
        in_specs=[
            pl.BlockSpec((None, Cin, t), lambda n, s: (n, 0, s)),
            pl.BlockSpec((None, Cin, t), lambda n, s: (n, 0, s)),
            pl.BlockSpec((Cin, 1), lambda n, s: (0, 0)),
            pl.BlockSpec((Cin, 1), lambda n, s: (0, 0)),
            pl.BlockSpec((Cout, Cin), lambda n, s: (0, 0)),
        ],
        out_specs=pl.BlockSpec((None, Cout, t), lambda n, s: (n, 0, s)),
        compiler_params=pltpu.CompilerParams(
            dimension_semantics=("parallel", "parallel"),
        ),
    )(x_rows, r_rows, scale, shift, w_mat)

    return out.reshape(N, Cout, H, W)


def _reference(x128, x115, weight, gamma, beta, eps=1e-5):
    # Pure-JAX reference (training-mode BN, biased variance, two-pass stats).
    mean = jnp.mean(x128, axis=(0, 2, 3), keepdims=True)
    var = jnp.mean((x128 - mean) ** 2, axis=(0, 2, 3), keepdims=True)
    xn = (x128 - mean) * jax.lax.rsqrt(var + eps)
    y = xn * gamma.reshape(1, -1, 1, 1) + beta.reshape(1, -1, 1, 1) + x115
    return jnp.einsum("nihw,oi->nohw", y, weight.reshape(weight.shape[0], -1))


if __name__ == "__main__":
    # Exact module shapes: (1, 40, 56, 56) -> (1, 240, 56, 56); HW = 3136.
    # Default tile_hw=1152 -> 3 grid steps along HW (exercises pipelining and
    # the ragged last block).
    N, Cin, H, W, Cout = 1, 40, 56, 56, 240

    key = jax.random.PRNGKey(0)
    k1, k2, k3, k4, k5 = jax.random.split(key, 5)
    x128 = jax.random.normal(k1, (N, Cin, H, W), dtype=jnp.float32)
    x115 = jax.random.normal(k2, (N, Cin, H, W), dtype=jnp.float32)
    # Deterministic synthetic parameters (no checkpoint load).
    weight = jax.random.normal(k3, (Cout, Cin, 1, 1), dtype=jnp.float32) * 0.1
    gamma = 1.0 + 0.1 * jax.random.normal(k4, (Cin,), dtype=jnp.float32)
    beta = 0.1 * jax.random.normal(k5, (Cin,), dtype=jnp.float32)

    out = bn_add_conv1x1(x128, x115, weight, gamma, beta)
    out = jax.block_until_ready(out)

    ref = _reference(x128, x115, weight, gamma, beta)
    assert out.shape == (N, Cout, H, W), out.shape
    assert jnp.allclose(out, ref, atol=2e-3, rtol=2e-3), float(
        jnp.max(jnp.abs(out - ref))
    )

    print("KERNEL_OK")
</pallas_src>

<mosaic_0001>
module attributes {stable_mosaic.version = 11 : i64} {
  func.func @_bn_add_conv_kernel(%arg0: i32, %arg1: i32, %arg2: memref<1x40x1152xf32, #tpu.memory_space<vmem>>, %arg3: memref<1x40x1152xf32, #tpu.memory_space<vmem>>, %arg4: memref<40x1xf32, #tpu.memory_space<vmem>>, %arg5: memref<40x1xf32, #tpu.memory_space<vmem>>, %arg6: memref<240x40xf32, #tpu.memory_space<vmem>>, %arg7: memref<1x240x1152xf32, #tpu.memory_space<vmem>>) attributes {dimension_semantics = [#tpu.dimension_semantics<parallel>, #tpu.dimension_semantics<parallel>], iteration_bounds = array<i64: 1, 3>, scalar_prefetch = 0 : i64, scratch_operands = 0 : i64, tpu.core_type = #tpu.core_type<tc>, window_params = [{transform_indices = @transform_0, window_bounds = array<i64: 1, 40, 1152>}, {transform_indices = @transform_1, window_bounds = array<i64: 1, 40, 1152>}, {pipeline_mode = #tpu.pipeline_mode<synchronous>, transform_indices = @transform_2, window_bounds = array<i64: 40, 1>}, {pipeline_mode = #tpu.pipeline_mode<synchronous>, transform_indices = @transform_3, window_bounds = array<i64: 40, 1>}, {pipeline_mode = #tpu.pipeline_mode<synchronous>, transform_indices = @transform_4, window_bounds = array<i64: 240, 40>}, {transform_indices = @transform_5, window_bounds = array<i64: 1, 240, 1152>}]} {
    %c0 = arith.constant 0 : index
    %c0_0 = arith.constant 0 : index
    %c0_1 = arith.constant 0 : index
    %0 = vector.load %arg2[%c0, %c0_0, %c0_1] : memref<1x40x1152xf32, #tpu.memory_space<vmem>>, vector<1x40x1152xf32>
    %1 = vector.shape_cast %0 : vector<1x40x1152xf32> to vector<40x1152xf32>
    %c0_2 = arith.constant 0 : index
    %c0_3 = arith.constant 0 : index
    %c0_4 = arith.constant 0 : index
    %2 = vector.load %arg3[%c0_2, %c0_3, %c0_4] : memref<1x40x1152xf32, #tpu.memory_space<vmem>>, vector<1x40x1152xf32>
    %3 = vector.shape_cast %2 : vector<1x40x1152xf32> to vector<40x1152xf32>
    %c0_5 = arith.constant 0 : index
    %c0_6 = arith.constant 0 : index
    %4 = vector.load %arg4[%c0_5, %c0_6] : memref<40x1xf32, #tpu.memory_space<vmem>>, vector<40x1xf32>
    %5 = vector.broadcast %4 : vector<40x1xf32> to vector<40x1152xf32>
    %6 = arith.mulf %1, %5 : vector<40x1152xf32>
    %c0_7 = arith.constant 0 : index
    %c0_8 = arith.constant 0 : index
    %7 = vector.load %arg5[%c0_7, %c0_8] : memref<40x1xf32, #tpu.memory_space<vmem>>, vector<40x1xf32>
    %8 = vector.broadcast %7 : vector<40x1xf32> to vector<40x1152xf32>
    %9 = arith.addf %6, %8 : vector<40x1152xf32>
    %10 = arith.addf %9, %3 : vector<40x1152xf32>
    %c0_9 = arith.constant 0 : index
    %c0_10 = arith.constant 0 : index
    %11 = vector.load %arg6[%c0_9, %c0_10] : memref<240x40xf32, #tpu.memory_space<vmem>>, vector<240x40xf32>
    %cst = arith.constant dense<0.000000e+00> : vector<240x1152xf32>
    %12 = tpu.matmul %11, %10, %cst {dimension_numbers = #tpu.dot_dimension_numbers<[1], [0], [0], [1], [0, 0, 1, 1], [], []>} : vector<240x40xf32>, vector<40x1152xf32>, vector<240x1152xf32> -> vector<240x1152xf32>
    %c0_11 = arith.constant 0 : index
    %c0_12 = arith.constant 0 : index
    %c0_13 = arith.constant 0 : index
    %13 = vector.load %arg7[%c0_11, %c0_12, %c0_13] : memref<1x240x1152xf32, #tpu.memory_space<vmem>>, vector<1x240x1152xf32>
    %14 = vector.shape_cast %13 : vector<1x240x1152xf32> to vector<240x1152xf32>
    %15 = vector.shape_cast %12 : vector<240x1152xf32> to vector<1x240x1152xf32>
    tpu.vector_store %arg7[%c0_11, %c0_12, %c0_13], %15 {strides = array<i32>} : memref<1x240x1152xf32, #tpu.memory_space<vmem>>, vector<1x240x1152xf32>,
    return
  }
  func.func @transform_0(%arg0: i32, %arg1: i32) -> (i32, i32, i32) {
    %c0_i32 = arith.constant 0 : i32
    %c0_i32_0 = arith.constant 0 : i32
    return %arg0, %c0_i32, %arg1 : i32, i32, i32
  }
  func.func @transform_1(%arg0: i32, %arg1: i32) -> (i32, i32, i32) {
    %c0_i32 = arith.constant 0 : i32
    %c0_i32_0 = arith.constant 0 : i32
    return %arg0, %c0_i32, %arg1 : i32, i32, i32
  }
  func.func @transform_2(%arg0: i32, %arg1: i32) -> (i32, i32) {
    %c0_i32 = arith.constant 0 : i32
    %c0_i32_0 = arith.constant 0 : i32
    %c0_i32_1 = arith.constant 0 : i32
    return %c0_i32, %c0_i32_0 : i32, i32
  }
  func.func @transform_3(%arg0: i32, %arg1: i32) -> (i32, i32) {
    %c0_i32 = arith.constant 0 : i32
    %c0_i32_0 = arith.constant 0 : i32
    %c0_i32_1 = arith.constant 0 : i32
    return %c0_i32, %c0_i32_0 : i32, i32
  }
  func.func @transform_4(%arg0: i32, %arg1: i32) -> (i32, i32) {
    %c0_i32 = arith.constant 0 : i32
    %c0_i32_0 = arith.constant 0 : i32
    %c0_i32_1 = arith.constant 0 : i32
    return %c0_i32, %c0_i32_0 : i32, i32
  }
  func.func @transform_5(%arg0: i32, %arg1: i32) -> (i32, i32, i32) {
    %c0_i32 = arith.constant 0 : i32
    %c0_i32_0 = arith.constant 0 : i32
    return %arg0, %c0_i32, %arg1 : i32, i32, i32
  }
}

</mosaic_0001>

<bundles_post_ra>
// kernel: tpu_custom_call.1
= control target key start
LH: loop header
LB: loop body
LE: loop exit
PB: predicated region body
PF: predicated region fallthrough
CT: control target
= control target key end

     0   :  { %10 = vsyncpa [#allocation3], 0  ;;  %s4155_s0 = inlined_call_operand.hbm [shape: f32[1,40,3136], index: 0, kind: input, shape index: {}]   ;;  %s4156_s1 = inlined_call_operand.hbm [shape: f32[1,40,3136], index: 1, kind: input, shape index: {}]   ;;  %s4157_s2 = inlined_call_operand.vmem [shape: f32[40,1], index: 2, kind: input, shape index: {}]   ;;  %s4158_s3 = inlined_call_operand.vmem [shape: f32[40,1], index: 3, kind: input, shape index: {}]   ;;  %s4159_s4 = inlined_call_operand.vmem [shape: f32[240,40], index: 4, kind: input, shape index: {}]   ;;  %s4160_s5 = inlined_call_operand.hbm [shape: f32[1,240,3136], index: 5, kind: output, shape index: {}]  }
   0x1   :  { %12 = vsyncpa [#allocation3 + $0x1], 0 }
   0x2   :  { %13 = vsyncpa [#allocation6], 0 }
   0x3   :  { %15 = vsyncpa [#allocation6 + $0x1], 0 }
   0x4   :  { %16 = vsyncpa [#allocation4], 0 }
   0x5   :  { %18 = vsyncpa [#allocation4 + $0x1], 0  ;;  %s2730_s18 = smov 0   ;;  %s2732_s19 = smov 0  }
   0x6   :  { %s2734_s20 = smov 0   ;;  %s2736_s21 = smov 0  }
   0x7   :  { %s2738_s22 = smov 0   ;;  %s2740_s23 = smov 0  }
   0x8 LB: > { %s2118_s24 = sadd.s32 4294967295, %s2688_s23   ;;  %s2119_s25 = sadd.s32 4294967294, %s2688_s23   ;;  %s2688_s23 = sphi %s2740_s23, %s24_s23   ;;  %s2684_s22 = sphi %s2738_s22, %s4181_s22   ;;  %s2680_s21 = sphi %s2736_s21, %s4180_s21   ;;  %s2676_s20 = sphi %s2734_s20, %s4179_s20   ;;  %s2672_s19 = sphi %s2732_s19, %s4178_s19   ;;  %s2668_s18 = sphi %s2730_s18, %s4177_s18  }
   0x9   : > { %s33_s26 = sadd.s32 1, %s2684_s22  ;;  %s45_s27 = sadd.s32 1, %s2676_s20 }
   0xa   : > { %p34_p0 = scmp.ge.s32.totalorder %s33_s26, 3  ;;  %p52_p1 = scmp.ne.s32.totalorder %s2676_s20, %s2672_s19 }
   0xb   : > { %p53_p2 = scmp.eq.s32.totalorder %s2688_s23, 0  ;;  %p58_p3 = scmp.ne.s32.totalorder %s2672_s19, %s2668_s18 }
   0xc   : > { %s4183_s26 = smov (%p34_p0, %s33_s26), 0  ;;  %p59_p5 = scmp.eq.s32.totalorder %s2118_s24, 0 }
   0xd   : > { %4163 = sst [smem:[#allocation11_spill]] %s4183_s26  ;;  %p2771_p4 = por %p53_p2, %p52_p1 }
   0xe   : > { %s41_s29 = ssub.s32 %s2684_s22, %s4183_s26  ;;  %p175_p6 = scmp.eq.s32.totalorder %s2118_s24, 2 }
   0xf   : > { %p43_p7 = scmp.eq.s32.totalorder %s41_s29, 0  ;;  %p2777_p8 = por %p59_p5, %p58_p3 }
  0x10   : > { %p2781_p9 = por %p175_p6, %p52_p1  ;;  %p181_p10 = scmp.eq.s32.totalorder %s2119_s25, 2 }
  0x11   : > { %s2786_s7 = scalar_select %p43_p7, %s2676_s20, %s45_s27  }
  0x12   : > { %p2788_p11 = por %p181_p10, %p58_p3  ;;  %p2121_p12 = scmp.ge.s32.totalorder %s2688_s23, 3 }
  0x13   : > { %4167 = sst [smem:[#allocation12_spill]] %s2786_s7 }
  0x14   : > { %s4168_s8 = scalar_select %p2788_p11, 1, 0 }
  0x15   : > { %206 = sbr.rel (%p2121_p12) target bundleno = 90 (0x5a), region = 28 }
  0x16   : > { %4169 = sst [smem:[#allocation13_spill]] %s4168_s8 }
  0x1a   : > { %209 = sbr.rel (!%p2771_p4) target bundleno = 58 (0x3a), region = 32  ;;  %s210_s9 = sand.u32 (%p2771_p4), 1, %s2676_s20  }
  0x1b   : > { %s215_s10 = smul.u32 (%p2771_p4), 9, %s2684_s22  ;;  %s2800_s16 = scalar_lea.sflag (%p2771_p4), [#allocation3], %s210_s9 }
  0x1c   : > { %s2428_s11 = smul.u32 (%p2771_p4), 360, %s210_s9 }
  0x1d   : > { %s216_s12 = ssub.s32 (%p2771_p4), 25, %s215_s10 }
  0x1e   : > { %p217_p13 = scmp.lt.s32.totalorder (%p2771_p4), %s216_s12, 9  ;;  %s214_s17 = scalar_lea.vmem (%p2771_p4), [#allocation2], %s2428_s11 }
  0x20   : > { %s4185_s12 = smov (!%p217_p13, %s216_s12), 9 }
  0x21   : > { %s219_s13 = smul.u32 40, %s4185_s12 }
  0x23   : > { %s220_s14 = ssub.s32 360, %s219_s13 }
  0x24   : > { %s221_s15 = sshll.u32 %s220_s14, 4 }
  0x25   : > { %222 = vsyncadd %s2800_s16, %s221_s15  ;;  %p2803_p0 = scmp.ne.s32.totalorder %s219_s13, 0  ;;  %s2410_s25 = smul.u32 72, %s2684_s22 }
  0x26   : > { %s2809_s29 = sshll.u32 %s214_s17, 4  ;;  %s2126_s14 = smul.u32 640, %s4185_s12  ;;  %s233_s29 = int_to_ptr.vmem [resolvable:$true] %s2809_s29 }
  0x27   : > { %s227_s9 = scalar_lea.hbm %s4155_s0, %s2410_s25  ;;  %s2532_s8 = sshra.s32 %s233_s29, 4  ;;  %s2533_s8 = int_to_ptr.vmem [resolvable:$true] %s2532_s8 }
  0x28   : > { %s230_s11 = sshll.u32 %s227_s9, 4  ;;  %s2515_s15 = sshrl.u32 %s2126_s14, 4  ;;  %s231_s11 = int_to_ptr.hbm [resolvable:$true] %s230_s11 }
  0x29   : > { %s2551_s7 = sshll.u32 %s2515_s15, 4  ;;  %s2518_s13 = sadd.s32 1, %s2515_s15 }
  0x2a   : > { %p2517_p1 = scmp.ne.s32.totalorder %s2551_s7, %s2126_s14  ;;  %s2690_s17 = smov [#allocation2]  }
  0x2b   : > { %s2543_s26 = scalar_lea.vmem %s2690_s17, 720 }
  0x2c   : > { %s4187_s13 = smov (!%p2517_p1, %s2518_s13), %s2515_s15 }
  0x2d   : > { %s2539_s27 = scalar_lea.vmem %s2533_s8, %s4187_s13 }
  0x2e   : > { %p2540_p2 = scmp.ne.s32.totalorder %s2533_s8, %s2539_s27  ;;  %p2545_p6 = scmp.lt.s32.totalorder %s2543_s26, %s2539_s27 }
  0x30   : > { %p2541_p3 = pnand %p2540_p2, %p2803_p0 }
  0x32   : > { %p2542_p5 = pneg %p2541_p3 }
  0x34   : > { %p2547_p7 = pnand %p2545_p6, %p2542_p5 }
  0x36   : > { %2550 = shalt.err (!%p2547_p7)
}
  0x37   : > { %s2691_s25 = smov 3200   ;;  %s2692_s10 = smov 1152  }
  0x38   : > { %s4171_s7 = sshll.u32 %s4185_s12, 3 }
  0x39   : > { %238 = dma.hbm_to_vmem [thread:$0]  (%p2803_p0), %s231_s11, %s2126_s14, %s233_s29, %s2800_s16, %s2691_s25, %s2692_s10, %s4171_s7  }
  0x3a PF: > { %241 = sbr.rel (!%p2771_p4) target bundleno = 90 (0x5a), region = 36  ;;  %s242_s8 = sand.u32 (%p2771_p4), 1, %s2676_s20  }
  0x3b   : > { %s247_s9 = smul.u32 (%p2771_p4), 9, %s2684_s22  ;;  %s2830_s24 = scalar_lea.sflag (%p2771_p4), [#allocation6], %s242_s8 }
  0x3c   : > { %s2429_s15 = smul.u32 (%p2771_p4), 360, %s242_s8 }
  0x3d   : > { %s248_s27 = ssub.s32 (%p2771_p4), 25, %s247_s9 }
  0x3e   : > { %p249_p10 = scmp.lt.s32.totalorder (%p2771_p4), %s248_s27, 9  ;;  %s246_s12 = scalar_lea.vmem (%p2771_p4), [#allocation5], %s2429_s15 }
  0x40   : > { %s4189_s27 = smov (!%p249_p10, %s248_s27), 9 }
  0x41   : > { %s251_s13 = smul.u32 40, %s4189_s27 }
  0x43   : > { %s252_s17 = ssub.s32 360, %s251_s13 }
  0x44   : > { %s253_s26 = sshll.u32 %s252_s17, 4 }
  0x45   : > { %254 = vsyncadd %s2830_s24, %s253_s26  ;;  %p2833_p4 = scmp.ne.s32.totalorder %s251_s13, 0  ;;  %s2411_s16 = smul.u32 72, %s2684_s22 }
  0x46   : > { %s2129_s29 = sshll.u32 %s4189_s27, 3  ;;  %s2839_s11 = sshll.u32 %s246_s12, 4  ;;  %s265_s11 = int_to_ptr.vmem [resolvable:$true] %s2839_s11 }
  0x47   : > { %s259_s10 = scalar_lea.hbm %s4156_s1, %s2411_s16  ;;  %s2131_s8 = smul.u32 640, %s4189_s27 }
  0x48   : > { %s262_s7 = sshll.u32 %s259_s10, 4  ;;  %s2571_s17 = sshra.s32 %s265_s11, 4  ;;  %s263_s7 = int_to_ptr.hbm [resolvable:$true] %s262_s7  ;;  %s2572_s17 = int_to_ptr.vmem [resolvable:$true] %s2571_s17 }
  0x49   : > { %s2554_s9 = sshrl.u32 %s2131_s8, 4  ;;  %s2693_s12 = smov [#allocation5]  }
  0x4a   : > { %s2590_s15 = sshll.u32 %s2554_s9, 4  ;;  %s2557_s13 = sadd.s32 1, %s2554_s9 }
  0x4b   : > { %p2556_p12 = scmp.ne.s32.totalorder %s2590_s15, %s2131_s8  ;;  %s2582_s14 = scalar_lea.vmem %s2693_s12, 720 }
  0x4d   : > { %s4191_s13 = smov (!%p2556_p12, %s2557_s13), %s2554_s9 }
  0x4e   : > { %s2578_s26 = scalar_lea.vmem %s2572_s17, %s4191_s13 }
  0x4f   : > { %p2579_p13 = scmp.ne.s32.totalorder %s2572_s17, %s2578_s26  ;;  %p2584_p2 = scmp.lt.s32.totalorder %s2582_s14, %s2578_s26 }
  0x51   : > { %p2580_p0 = pnand %p2579_p13, %p2833_p4 }
  0x53   : > { %p2581_p1 = pneg %p2580_p0 }
  0x55   : > { %p2586_p3 = pnand %p2584_p2, %p2581_p1 }
  0x57   : > { %2589 = shalt.err (!%p2586_p3)
}
  0x58   : > { %s2694_s16 = smov 3200   ;;  %s2695_s25 = smov 1152  }
  0x59   : > { %270 = dma.hbm_to_vmem [thread:$0]  (%p2833_p4), %s263_s7, %s2131_s8, %s265_s11, %s2830_s24, %s2694_s16, %s2695_s25, %s2129_s29  }
  0x5a PF: > { %p2132_p5 = scmp.ge.s32.totalorder %s2688_s23, 1  ;;  %p272_p6 = scmp.lt.s32.totalorder %s2688_s23, 4 }
  0x5c   : > { %p273_p7 = pnand %p2132_p5, %p272_p6 }
  0x5d   : > { %s2856_s10 = sand.u32 (!%p273_p7), 1, %s2672_s19  }
  0x5e   : > { %276 = sbr.rel (%p273_p7) target bundleno = 962 (0x3c2), region = 40  ;;  %s279_s15 = scalar_lea.sflag (!%p273_p7), [#allocation3], %s2856_s10 }
  0x5f   : > { %s2430_s9 = smul.u32 (!%p273_p7), 360, %s2856_s10 }
  0x61   : > { %s2860_s13 = scalar_lea.vmem (!%p273_p7), [#allocation2], %s2430_s9 }
  0x63   : > { %2655 = dma.done.wait (%p2777_p8), %s279_s15, 5760  }
  0x64   : > { %2657 = vsyncadd (%p2777_p8), %s279_s15, 4294961536  ;;  %s289_s27 = scalar_lea.sflag [#allocation6], %s2856_s10  ;;  %s2867_s24 = scalar_lea.vmem [#allocation5], %s2430_s9 }
  0x65   : > { %2659 = dma.done.wait (%p2777_p8), %s289_s27, 5760  }
  0x66   : > { %2661 = vsyncadd (%p2777_p8), %s289_s27, 4294961536  ;;  %v2696_v0 = vmov 0   ;;  %v509_v1 = vld [vmem:[%s4158_s3 + $0x20] sm:$0xff]  ;;  %v508_v3 = vld [vmem:[%s4158_s3 + $0x18] sm:$0xff]  ;;  %vm655_vm0 = vcmask 326656   ;;  %s2431_s27 = smul.u32 2160, %s2856_s10 }
  0x67   : > { %2496 = vset.pattern.permute.xlu1 %v2696_v0  ;;  %2495 = vset.pattern.permute.xlu0 %v2696_v0  ;;  %v434_v2 = vld [vmem:[%s4157_s2 + $0x20] sm:$0xff]  ;;  %v433_v4 = vld [vmem:[%s4157_s2 + $0x18] sm:$0xff]  ;;  %v432_v5 = vld [vmem:[%s4157_s2 + $0x10] sm:$0xff]  ;;  %s1980_s15 = scalar_lea.sflag [#allocation4], %s2856_s10 }
  0x68   : > { %2497 = vset.pattern.permute.xlu2 %v2696_v0  ;;  %532 = vperm.xlu1 %2496, %v509_v1   ;;  %v431_v6 = vld [vmem:[%s4157_s2 + $0x8] sm:$0xff]  ;;  %v507_v7 = vld [vmem:[%s4158_s3 + $0x10] sm:$0xff]  ;;  %v430_v8 = vld [vmem:[%s4157_s2] sm:$0xff] }
  0x69   : > { %457 = vperm.xlu0 %2495, %v434_v2   ;;  %527 = vperm.xlu2 %2497, %v508_v3   ;;  %v506_v9 = vld [vmem:[%s4158_s3 + $0x8] sm:$0xff]  ;;  %v505_v10 = vld [vmem:[%s4158_s3] sm:$0xff]  ;;  %v421_v17 = vld [vmem:[%s2867_s24 + $0x120] sm:$0xff] }
  0x6a   : > { %v376_v12 = vld [vmem:[%s2860_s13 + $0x120] sm:$0xff]  ;;  %v349_v20 = vld [vmem:[%s2860_s13 + $0x48] sm:$0xff]  ;;  %v350_v21 = vld [vmem:[%s2860_s13 + $0x50] sm:$0xff] }
  0x6b   : > { %v367_v22 = vld [vmem:[%s2860_s13 + $0xd8] sm:$0xff]  ;;  %v352_v24 = vld [vmem:[%s2860_s13 + $0x60] sm:$0xff]  ;;  %v353_v25 = vld [vmem:[%s2860_s13 + $0x68] sm:$0xff] }
  0x6c   : > { %v351_v23 = vld [vmem:[%s2860_s13 + $0x58] sm:$0xff]  ;;  %v354_v26 = vld [vmem:[%s2860_s13 + $0x70] sm:$0xff]  ;;  %v412_v34 = vld [vmem:[%s2867_s24 + $0xd8] sm:$0xff] }
  0x6d   : > { %v377_v39 = vld [vmem:[%s2860_s13 + $0x128] sm:$0xff]  ;;  %v358_v40 = vld [vmem:[%s2860_s13 + $0x90] sm:$0xff]  ;;  %v355_v43 = vld [vmem:[%s2860_s13 + $0x78] sm:$0xff] }
  0x6e   : > { %v356_v44 = vld [vmem:[%s2860_s13 + $0x80] sm:$0xff]  ;;  %v394_v46 = vld [vmem:[%s2867_s24 + $0x48] sm:$0xff]  ;;  %v378_v47 = vld [vmem:[%s2860_s13 + $0x130] sm:$0xff] }
  0x6f   : > { %v395_v48 = vld [vmem:[%s2867_s24 + $0x50] sm:$0xff]  ;;  %v379_v50 = vld [vmem:[%s2860_s13 + $0x138] sm:$0xff]  ;;  %v396_v52 = vld [vmem:[%s2867_s24 + $0x58] sm:$0xff] }
  0x70   : > { %447 = vperm.xlu1 %2496, %v432_v5   ;;  %v380_v51 = vld [vmem:[%s2860_s13 + $0x140] sm:$0xff]  ;;  %v397_v57 = vld [vmem:[%s2867_s24 + $0x60] sm:$0xff]  ;;  %v398_v58 = vld [vmem:[%s2867_s24 + $0x68] sm:$0xff] }
  0x71   : > { %452 = vperm.xlu0 %2495, %v433_v4   ;;  %442 = vperm.xlu2 %2497, %v431_v6   ;;  %v381_v59 = vld [vmem:[%s2860_s13 + $0x148] sm:$0xff]  ;;  %v403_v63 = vld [vmem:[%s2867_s24 + $0x90] sm:$0xff] }
  0x72   : > { %v357_v3 = vld [vmem:[%s2860_s13 + $0x88] sm:$0xff] }
  0x78   : > { %437 = vperm.xlu1 %2496, %v430_v8  }
  0x79   : > { %522 = vperm.xlu0 %2495, %v507_v7   ;;  %517 = vperm.xlu2 %2497, %v506_v9   ;;  %v368_v7 = vld [vmem:[%s2860_s13 + $0xe0] sm:$0xff]  ;;  %v382_v9 = vld [vmem:[%s2860_s13 + $0x150] sm:$0xff] }
  0x81   : > { %512 = vperm.xlu0 %2495, %v505_v10   ;;  %v383_v10 = vld [vmem:[%s2860_s13 + $0x158] sm:$0xff] }
  0xc3   : > { %v2903_v11 = vpop.permute.xlu2 %527 }
  0xcb   : > { %v2906_v13 = vpop.permute.xlu2 %442 }
  0xcc   : > { %v469_v28 = vmul.f32 %v2906_v13, %v349_v20  ;;  %v470_v29 = vmul.f32 %v2906_v13, %v350_v21  ;;  %v471_v32 = vmul.f32 %v2906_v13, %v351_v23  ;;  %v472_v35 = vmul.f32 %v2906_v13, %v352_v24  ;;  %v370_v21 = vld [vmem:[%s2860_s13 + $0xf0] sm:$0xff] }
  0xcd   : > { %v473_v36 = vmul.f32 %v2906_v13, %v353_v25  ;;  %v474_v37 = vmul.f32 %v2906_v13, %v354_v26  ;;  %v475_v60 = vmul.f32 %v2906_v13, %v355_v43  ;;  %v476_v61 = vmul.f32 %v2906_v13, %v356_v44  ;;  %v340_v26 = vld [vmem:[%s2860_s13] sm:$0xff]  ;;  %v425_v44 = vld [vmem:[%s2867_s24 + $0x140] sm:$0xff] }
  0xce   : > { %v477_v24 = vmul.f32 %v2906_v13, %v357_v3  ;;  %v414_v3 = vld [vmem:[%s2867_s24 + $0xe8] sm:$0xff] }
  0xd3   : > { %v2926_v30 = vpop.permute.xlu2 %517 }
  0xd4   : > { %v544_v41 = vadd.f32 %v2926_v30, %v469_v28  ;;  %v545_v42 = vadd.f32 %v2926_v30, %v470_v29  ;;  %v546_v49 = vadd.f32 %v2926_v30, %v471_v32  ;;  %v547_v53 = vadd.f32 %v2926_v30, %v472_v35 }
  0xd5   : > { %v548_v54 = vadd.f32 %v2926_v30, %v473_v36  ;;  %v2953_v55 = vadd.f32 %v2926_v30, %v474_v37  ;;  %v2988_v23 = vadd.f32 %v2926_v30, %v476_v61  ;;  %v422_v37 = vld [vmem:[%s2867_s24 + $0x128] sm:$0xff]  ;;  %v361_v61 = vld [vmem:[%s2860_s13 + $0xa8] sm:$0xff] }
  0xd6   : > { %v589_v0 = vadd.f32 %v544_v41, %v394_v46  ;;  %v2965_v2 = vadd.f32 %v545_v42, %v395_v48  ;;  %v2972_v8 = vadd.f32 %v546_v49, %v396_v52  ;;  %v426_v46 = vld [vmem:[%s2867_s24 + $0x148] sm:$0xff]  ;;  %v3014_v48 = vadd.f32 %v2926_v30, %v477_v24 }
  0xd7   : > { %v359_v52 = vld [vmem:[%s2860_s13 + $0x98] sm:$0xff] }
  0xda   : > { %v2908_v14 = vpop.permute.xlu1 %532 }
  0xdb   : > { %v2910_v15 = vpop.permute.xlu0 %457 }
  0xdc   : > { %v496_v16 = vmul.f32 %v2910_v15, %v376_v12  ;;  %v497_v1 = vmul.f32 %v2910_v15, %v377_v39  ;;  %v498_v5 = vmul.f32 %v2910_v15, %v378_v47  ;;  %v499_v6 = vmul.f32 %v2910_v15, %v379_v50  ;;  %v424_v39 = vld [vmem:[%s2867_s24 + $0x138] sm:$0xff]  ;;  %v384_v47 = vld [vmem:[%s2860_s13 + $0x160] sm:$0xff]  ;;  %v385_v50 = vld [vmem:[%s2867_s24] sm:$0xff] }
  0xdd   : > { %v500_v12 = vmul.f32 %v2910_v15, %v380_v51  ;;  %v502_v32 = vmul.f32 %v2910_v15, %v382_v9 }
  0xde   : > { %v571_v18 = vadd.f32 %v2908_v14, %v496_v16  ;;  %v369_v16 = vld [vmem:[%s2860_s13 + $0xe8] sm:$0xff]  ;;  %v572_v28 = vadd.f32 %v2908_v14, %v497_v1  ;;  %v573_v35 = vadd.f32 %v2908_v14, %v498_v5  ;;  %v574_v13 = vadd.f32 %v2908_v14, %v499_v6 }
  0xe0   : > { %v616_v19 = vadd.f32 %v571_v18, %v421_v17  ;;  %v2978_v17 = vadd.f32 %v547_v53, %v397_v57  ;;  %v2980_v18 = vadd.f32 %v548_v54, %v398_v58  ;;  %v360_v53 = vld [vmem:[%s2860_s13 + $0xa0] sm:$0xff]  ;;  %v3023_v54 = vadd.f32 %v2908_v14, %v502_v32 }
  0xe1   : > { %v617_v57 = vadd.f32 %v572_v28, %v422_v37  ;;  %v504_v28 = vmul.f32 %v2910_v15, %v384_v47 }
  0xe2   : > { %757 = vmatpush.msra.mxu0 %v616_v19  ;;  %2413 = vmatpush.msra.mxu1 %v616_v19  ;;  %v2930_v33 = vpop.permute.xlu1 %447 }
  0xe3   : > { %2414 = vmatpush.msra.mxu2 %v616_v19  ;;  %2415 = vmatpush.msra.mxu3 %v616_v19  ;;  %v2922_v27 = vpop.permute.xlu0 %452  ;;  %v478_v56 = vmul.f32 %v2930_v33, %v358_v40  ;;  %v501_v19 = vmul.f32 %v2910_v15, %v381_v59  ;;  %v575_v40 = vadd.f32 %v2908_v14, %v500_v12  ;;  %v413_v59 = vld [vmem:[%s2867_s24 + $0xe0] sm:$0xff] }
  0xe4   : > { %v487_v31 = vmul.f32 %v2922_v27, %v367_v22  ;;  %v2985_v22 = vadd.f32 %v2926_v30, %v475_v60  ;;  %v488_v29 = vmul.f32 %v2922_v27, %v368_v7  ;;  %v489_v36 = vmul.f32 %v2922_v27, %v369_v16  ;;  %v415_v7 = vld [vmem:[%s2867_s24 + $0xf0] sm:$0xff] }
  0xe5   : > { %v490_v41 = vmul.f32 %v2922_v27, %v370_v21  ;;  %v576_v42 = vadd.f32 %v2908_v14, %v501_v19  ;;  %v620_v1 = vadd.f32 %v575_v40, %v425_v44  ;;  %v480_v12 = vmul.f32 %v2930_v33, %v360_v53  ;;  %v372_v16 = vld [vmem:[%s2860_s13 + $0x100] sm:$0xff]  ;;  %v416_v21 = vld [vmem:[%s2867_s24 + $0xf8] sm:$0xff]  ;;  %v342_v40 = vld [vmem:[%s2860_s13 + $0x10] sm:$0xff] }
  0xe6   : > { %v562_v38 = vadd.f32 %v2903_v11, %v487_v31  ;;  %v371_v31 = vld [vmem:[%s2860_s13 + $0xf8] sm:$0xff]  ;;  %v563_v51 = vadd.f32 %v2903_v11, %v488_v29  ;;  %v564_v60 = vadd.f32 %v2903_v11, %v489_v36  ;;  %v481_v24 = vmul.f32 %v2930_v33, %v361_v61  ;;  %v373_v29 = vld [vmem:[%s2860_s13 + $0x108] sm:$0xff] }
  0xe7   : > { %v3035_v5 = vadd.f32 %v576_v42, %v426_v46  ;;  %v3045_v19 = vld [vmem:[%s4159_s4 + $0x80] sm:$0xff]  ;;  %v493_v47 = vmul.f32 %v2922_v27, %v373_v29 }
  0xe8   : > { %v607_v45 = vadd.f32 %v562_v38, %v412_v34  ;;  %v503_v34 = vmul.f32 %v2910_v15, %v383_v10  ;;  %v423_v38 = vld [vmem:[%s2867_s24 + $0x130] sm:$0xff]  ;;  %v479_v10 = vmul.f32 %v2930_v33, %v359_v52  ;;  %v375_v36 = vld [vmem:[%s2860_s13 + $0x118] sm:$0xff]  ;;  %v404_v15 = vld [vmem:[%s2867_s24 + $0x98] sm:$0xff] }
  0xe9   : > { %v618_v58 = vadd.f32 %v573_v35, %v423_v38  ;;  %v341_v35 = vld [vmem:[%s2860_s13 + $0x8] sm:$0xff]  ;;  %v405_v38 = vld [vmem:[%s2867_s24 + $0xa0] sm:$0xff]  ;;  %v344_v46 = vld [vmem:[%s2860_s13 + $0x20] sm:$0xff]  ;;  %v495_v53 = vmul.f32 %v2922_v27, %v375_v36 }
  0xea   : > { %758 = vmatpush.msra.mxu0 %v607_v45  ;;  %2416 = vmatpush.msra.mxu1 %v607_v45  ;;  %v2991_v25 = vpop.permute.xlu1 %437  ;;  %v3026_v30 = vadd.f32 %v2908_v14, %v503_v34 }
  0xeb   : > { %2417 = vmatpush.msra.mxu2 %v607_v45  ;;  %2418 = vmatpush.msra.mxu3 %v607_v45  ;;  %v2961_v62 = vpop.permute.xlu0 %522  ;;  %v460_v43 = vmul.f32 %v2991_v25, %v340_v26  ;;  %v491_v45 = vmul.f32 %v2922_v27, %v371_v31  ;;  %v609_v31 = vadd.f32 %v564_v60, %v414_v3  ;;  %v3077_v60 = vld [vmem:[%s4159_s4 + $0x40] sm:$0xff] }
  0xec   : > { %v553_v4 = vadd.f32 %v2961_v62, %v478_v56  ;;  %v554_v32 = vadd.f32 %v2961_v62, %v479_v10  ;;  %v555_v34 = vadd.f32 %v2961_v62, %v480_v12 }
  0xed   : > { %v566_v9 = vadd.f32 %v2903_v11, %v491_v45  ;;  %v343_v45 = vld [vmem:[%s2860_s13 + $0x18] sm:$0xff] }
  0xee   : > { %v598_v20 = vadd.f32 %v553_v4, %v403_v63  ;;  %v362_v63 = vld [vmem:[%s2860_s13 + $0xb0] sm:$0xff]  ;;  %v565_v4 = vadd.f32 %v2903_v11, %v490_v41  ;;  %v492_v41 = vmul.f32 %v2922_v27, %v372_v16  ;;  %v463_v61 = vmul.f32 %v2991_v25, %v343_v45 }
  0xef   : > { %v482_v26 = vmul.f32 %v2930_v33, %v362_v63  ;;  %v611_v42 = vadd.f32 %v566_v9, %v416_v21  ;;  %v363_v63 = vld [vmem:[%s2860_s13 + $0xb8] sm:$0xff]  ;;  %v387_v9 = vld [vmem:[%s2867_s24 + $0x10] sm:$0xff]  ;;  %v579_v16 = vadd.f32 %v2908_v14, %v504_v28 }
  0xf0   : > { %759 = vmatpush.msra.mxu0 %v598_v20  ;;  %2419 = vmatpush.msra.mxu1 %v598_v20  ;;  %v610_v37 = vadd.f32 %v565_v4, %v415_v7  ;;  %v386_v7 = vld [vmem:[%s2867_s24 + $0x8] sm:$0xff]  ;;  %v3101_v21 = vld [vmem:[%s4159_s4 + $0x88] sm:$0xff]  ;;  %v567_v29 = vadd.f32 %v2903_v11, %v492_v41  ;;  %v483_v14 = vmul.f32 %v2930_v33, %v363_v63 }
  0xf1   : > { %2420 = vmatpush.msra.mxu2 %v598_v20  ;;  %2421 = vmatpush.msra.mxu3 %v598_v20  ;;  %v608_v20 = vadd.f32 %v563_v51, %v413_v59  ;;  %v557_v44 = vadd.f32 %v2961_v62, %v482_v26  ;;  %v461_v51 = vmul.f32 %v2991_v25, %v341_v35  ;;  %v389_v26 = vld [vmem:[%s2867_s24 + $0x20] sm:$0xff]  ;;  %v427_v28 = vld [vmem:[%s2867_s24 + $0x150] sm:$0xff] }
  0xf2   : > { %760 = vmatpush.msra.mxu0 %v589_v0  ;;  %2422 = vmatpush.msra.mxu1 %v589_v0  ;;  %v462_v59 = vmul.f32 %v2991_v25, %v342_v40  ;;  %v418_v40 = vld [vmem:[%s2867_s24 + $0x108] sm:$0xff] }
  0xf3   : > { %2423 = vmatpush.msra.mxu2 %v589_v0  ;;  %2424 = vmatpush.msra.mxu3 %v589_v0  ;;  %v3016_v49 = vpop.permute.xlu0 %512  ;;  %v619_v0 = vadd.f32 %v574_v13, %v424_v39  ;;  %v374_v13 = vld [vmem:[%s2860_s13 + $0x110] sm:$0xff]  ;;  %v556_v39 = vadd.f32 %v2961_v62, %v481_v24  ;;  %v388_v24 = vld [vmem:[%s2867_s24 + $0x18] sm:$0xff] }
  0xf4   : > { %v535_v56 = vadd.f32 %v3016_v49, %v460_v43  ;;  %v406_v43 = vld [vmem:[%s2867_s24 + $0xa8] sm:$0xff]  ;;  %v494_v52 = vmul.f32 %v2922_v27, %v374_v13  ;;  %v464_v27 = vmul.f32 %v2991_v25, %v344_v46  ;;  %v536_v3 = vadd.f32 %v3016_v49, %v461_v51  ;;  %v366_v13 = vld [vmem:[%s2860_s13 + $0xd0] sm:$0xff] }
  0xf5   : > { %v537_v4 = vadd.f32 %v3016_v49, %v462_v59  ;;  %v538_v10 = vadd.f32 %v3016_v49, %v463_v61  ;;  %v486_v46 = vmul.f32 %v2930_v33, %v366_v13  ;;  %v409_v51 = vld [vmem:[%s2867_s24 + $0xc0] sm:$0xff] }
  0xf6   : > { %v580_v6 = vadd.f32 %v535_v56, %v385_v50  ;;  %v407_v50 = vld [vmem:[%s2867_s24 + $0xb0] sm:$0xff]  ;;  %v599_v56 = vadd.f32 %v554_v32, %v404_v15  ;;  %v539_v12 = vadd.f32 %v3016_v49, %v464_v27  ;;  %v569_v32 = vadd.f32 %v2903_v11, %v494_v52  ;;  %v428_v15 = vld [vmem:[%s2867_s24 + $0x158] sm:$0xff] }
  0xf7   : > { %v581_v36 = vadd.f32 %v536_v3, %v386_v7  ;;  %v561_v59 = vadd.f32 %v2961_v62, %v486_v46  ;;  %v3157_v7 = vld [vmem:[%s4159_s4 + $0x48] sm:$0xff]  ;;  %v3279_v46 = vld [vmem:[%s4159_s4 + $0xe0] sm:$0xff] }
  0xf8   : > { %761 = vmatpush.msra.mxu0 %v580_v6  ;;  %2425 = vmatpush.msra.mxu1 %v580_v6 }
  0xf9   : > { %2426 = vmatpush.msra.mxu2 %v580_v6  ;;  %2427 = vmatpush.msra.mxu3 %v580_v6  ;;  %v364_v6 = vld [vmem:[%s2860_s13 + $0xc0] sm:$0xff] }
  0xfa   : > { %2149 = vmatmul.msk.f32.vlgmr.msra.gmra.mxu2 %vm655_vm0, %v3045_v19  ;;  %864 = vmatpush.msrb.mxu1 %v617_v57  ;;  %v600_v57 = vadd.f32 %v555_v34, %v405_v38  ;;  %v570_v34 = vadd.f32 %v2903_v11, %v495_v53  ;;  %v484_v35 = vmul.f32 %v2930_v33, %v364_v6  ;;  %v346_v53 = vld [vmem:[%s2860_s13 + $0x30] sm:$0xff] }
  0xfb   : > { %971 = vmatpush.msrb.mxu2 %v618_v58  ;;  %1078 = vmatpush.msrb.mxu3 %v619_v0  ;;  %v601_v58 = vadd.f32 %v556_v39, %v406_v43  ;;  %v602_v0 = vadd.f32 %v557_v44, %v407_v50  ;;  %v558_v38 = vadd.f32 %v2961_v62, %v483_v14  ;;  %v420_v43 = vld [vmem:[%s2867_s24 + $0x118] sm:$0xff] }
  0xfc   : > { %1185 = vmatpush.msrb.mxu0 %v620_v1  ;;  %865 = vmatpush.msrb.mxu1 %v608_v20  ;;  %v3085_v1 = vld [vmem:[%s4159_s4] sm:$0xff]  ;;  %v365_v20 = vld [vmem:[%s2860_s13 + $0xc8] sm:$0xff]  ;;  %v584_v39 = vadd.f32 %v539_v12, %v389_v26  ;;  %v559_v45 = vadd.f32 %v2961_v62, %v484_v35  ;;  %v615_v27 = vadd.f32 %v570_v34, %v420_v43 }
  0xfd   : > { %972 = vmatpush.msrb.mxu2 %v609_v31  ;;  %1079 = vmatpush.msrb.mxu3 %v610_v37  ;;  %v568_v31 = vadd.f32 %v2903_v11, %v493_v47  ;;  %v582_v37 = vadd.f32 %v537_v4, %v387_v9  ;;  %v583_v11 = vadd.f32 %v538_v10, %v388_v24  ;;  %v408_v44 = vld [vmem:[%s2867_s24 + $0xb8] sm:$0xff]  ;;  %v401_v10 = vld [vmem:[%s2867_s24 + $0x80] sm:$0xff]  ;;  %v402_v26 = vld [vmem:[%s2867_s24 + $0x88] sm:$0xff] }
  0xfe   : > { %1186 = vmatpush.msrb.mxu0 %v611_v42  ;;  %866 = vmatpush.msrb.mxu1 %v599_v56  ;;  %v485_v41 = vmul.f32 %v2930_v33, %v365_v20  ;;  %v419_v42 = vld [vmem:[%s2867_s24 + $0x110] sm:$0xff]  ;;  %v623_v47 = vadd.f32 %v3026_v30, %v428_v15  ;;  %v603_v63 = vadd.f32 %v558_v38, %v408_v44  ;;  %v400_v9 = vld [vmem:[%s2867_s24 + $0x78] sm:$0xff] }
  0xff   : > { %973 = vmatpush.msrb.mxu2 %v600_v57  ;;  %1080 = vmatpush.msrb.mxu3 %v601_v58  ;;  %v613_v33 = vadd.f32 %v568_v31, %v418_v40  ;;  %v410_v57 = vld [vmem:[%s2867_s24 + $0xc8] sm:$0xff]  ;;  %v348_v30 = vld [vmem:[%s2860_s13 + $0x40] sm:$0xff]  ;;  %v614_v61 = vadd.f32 %v569_v32, %v419_v42  ;;  %v604_v3 = vadd.f32 %v559_v45, %v409_v51  ;;  %v3298_v51 = vld [vmem:[%s4159_s4 + $0xb0] sm:$0xff] }
 0x100   : > { %1187 = vmatpush.msrb.mxu0 %v602_v0  ;;  %2141 = vmatmul.msk.f32.vlgmr.msra.gmra.mxu1 %vm655_vm0, %v3077_v60  ;;  %v560_v52 = vadd.f32 %v2961_v62, %v485_v41  ;;  %v347_v58 = vld [vmem:[%s2860_s13 + $0x38] sm:$0xff]  ;;  %v411_v0 = vld [vmem:[%s2867_s24 + $0xd0] sm:$0xff]  ;;  %v466_v6 = vmul.f32 %v2991_v25, %v346_v53  ;;  %v595_v35 = vadd.f32 %v2985_v22, %v400_v9  ;;  %v3317_v53 = vld [vmem:[%s4159_s4 + $0x30] sm:$0xff] }
 0x101   : > { %2133 = vmatmul.msk.f32.vlgmr.msra.gmra.mxu0 %vm655_vm0, %v3085_v1  ;;  %867 = vmatpush.msrb.mxu1 %v2965_v2  ;;  %v429_v2 = vld [vmem:[%s2867_s24 + $0x160] sm:$0xff]  ;;  %v467_v12 = vmul.f32 %v2991_v25, %v347_v58  ;;  %v606_v20 = vadd.f32 %v561_v59, %v411_v0  ;;  %v3166_v24 = vld [vmem:[%s4159_s4 + $0x8] sm:$0xff]  ;;  %v596_v13 = vadd.f32 %v2988_v23, %v401_v10  ;;  %v3256_v43 = vld [vmem:[%s4159_s4 + $0x60] sm:$0xff] }
 0x102   : > { %974 = vmatpush.msrb.mxu2 %v2972_v8  ;;  %1081 = vmatpush.msrb.mxu3 %v2978_v17  ;;  %v3127_v8 = vld [vmem:[%s4159_s4 + $0xc0] sm:$0xff]  ;;  %v417_v17 = vld [vmem:[%s2867_s24 + $0x100] sm:$0xff]  ;;  %v624_v50 = vadd.f32 %v579_v16, %v429_v2  ;;  %v605_v62 = vadd.f32 %v560_v52, %v410_v57  ;;  %v468_v16 = vmul.f32 %v2991_v25, %v348_v30  ;;  %v3195_v38 = vld [vmem:[%s4159_s4 + $0xc8] sm:$0xff] }
 0x103   : > { %1188 = vmatpush.msrb.mxu0 %v2980_v18  ;;  %2150 = vmatmul.msk.f32.gmra.mxu2 %vm655_vm0, %v3101_v21  ;;  %v622_v18 = vadd.f32 %v3023_v54, %v427_v28  ;;  %v345_v54 = vld [vmem:[%s2860_s13 + $0x28] sm:$0xff]  ;;  %v612_v56 = vadd.f32 %v567_v29, %v417_v17  ;;  %v541_v31 = vadd.f32 %v3016_v49, %v466_v6  ;;  %v391_v28 = vld [vmem:[%s2867_s24 + $0x30] sm:$0xff]  ;;  %v3228_v40 = vld [vmem:[%s4159_s4 + $0x58] sm:$0xff]  ;;  %s3413_s13 = scalar_lea.vmem [#allocation7], %s2431_s27  ;;  %s1987_s27 = smul.u32 (%p2781_p9), 9, %s2680_s21 }
 0x104   : > { %868 = vmatpush.msrb.mxu1 %v581_v36  ;;  %975 = vmatpush.msrb.mxu2 %v582_v37  ;;  %v465_v4 = vmul.f32 %v2991_v25, %v345_v54  ;;  %v390_v25 = vld [vmem:[%s2867_s24 + $0x28] sm:$0xff]  ;;  %v542_v32 = vadd.f32 %v3016_v49, %v467_v12  ;;  %v543_v34 = vadd.f32 %v3016_v49, %v468_v16  ;;  %v3183_v36 = vld [vmem:[%s4159_s4 + $0x90] sm:$0xff]  ;;  %v3270_v45 = vld [vmem:[%s4159_s4 + $0xa8] sm:$0xff] }
 0x105   : > { %1082 = vmatpush.msrb.mxu3 %v583_v11  ;;  %1189 = vmatpush.msrb.mxu0 %v584_v39  ;;  %v393_v37 = vld [vmem:[%s2867_s24 + $0x40] sm:$0xff]  ;;  %v586_v2 = vadd.f32 %v541_v31, %v391_v28  ;;  %v3261_v44 = vld [vmem:[%s4159_s4 + $0x20] sm:$0xff]  ;;  %v3307_v52 = vld [vmem:[%s4159_s4 + $0xe8] sm:$0xff]  ;;  %s1988_s28 = ssub.s32 (%p2781_p9), 25, %s1987_s27 }
 0x106   : > { %2157 = vmatmul.msk.f32.vlgmr.msra.gmra.mxu3 %vm655_vm0, %v3127_v8  ;;  %1292 = vmatpush.msra.mxu1 %v3035_v5  ;;  %v399_v5 = vld [vmem:[%s2867_s24 + $0x70] sm:$0xff]  ;;  %v540_v29 = vadd.f32 %v3016_v49, %v465_v4  ;;  %v597_v49 = vadd.f32 %v3014_v48, %v402_v26  ;;  %v588_v23 = vadd.f32 %v543_v34, %v393_v37  ;;  %v3200_v48 = vld [vmem:[%s4159_s4 + $0x50] sm:$0xff]  ;;  %v3214_v39 = vld [vmem:[%s4159_s4 + $0x98] sm:$0xff]  ;;  %p1989_p8 = scmp.lt.s32.totalorder (%p2781_p9), %s1988_s28, 9 }
 0x107   : > { %1399 = vmatpush.msra.mxu2 %v622_v18  ;;  %1506 = vmatpush.msra.mxu3 %v623_v47  ;;  %v594_v14 = vadd.f32 %v2953_v55, %v399_v5  ;;  %v392_v55 = vld [vmem:[%s2867_s24 + $0x38] sm:$0xff]  ;;  %v3233_v41 = vld [vmem:[%s4159_s4 + $0x18] sm:$0xff]  ;;  %v3242_v18 = vld [vmem:[%s4159_s4 + $0xa0] sm:$0xff] }
 0x108   : > { %1613 = vmatpush.msra.mxu0 %v624_v50  ;;  %1293 = vmatpush.msra.mxu1 %v612_v56  ;;  %v585_v15 = vadd.f32 %v540_v29, %v390_v25  ;;  %v587_v22 = vadd.f32 %v542_v32, %v392_v55  ;;  %v3205_v11 = vld [vmem:[%s4159_s4 + $0x10] sm:$0xff]  ;;  %v3251_v42 = vld [vmem:[%s4159_s4 + $0xd8] sm:$0xff]  ;;  %v3284_v47 = vld [vmem:[%s4159_s4 + $0x68] sm:$0xff] }
 0x109   : > { %1400 = vmatpush.msra.mxu2 %v613_v33  ;;  %1507 = vmatpush.msra.mxu3 %v614_v61  ;;  %v3223_v17 = vld [vmem:[%s4159_s4 + $0xd0] sm:$0xff]  ;;  %v3289_v50 = vld [vmem:[%s4159_s4 + $0x28] sm:$0xff]  ;;  %v3326_v56 = vld [vmem:[%s4159_s4 + $0xb8] sm:$0xff] }
 0x10a   : > { %1614 = vmatpush.msra.mxu0 %v615_v27  ;;  %1294 = vmatpush.msra.mxu1 %v603_v63  ;;  %v3312_v54 = vld [vmem:[%s4159_s4 + $0x70] sm:$0xff]  ;;  %v3335_v33 = vld [vmem:[%s4159_s4 + $0x78] sm:$0xff] }
 0x10b   : > { %1401 = vmatpush.msra.mxu2 %v604_v3  ;;  %1508 = vmatpush.msra.mxu3 %v605_v62  ;;  %v3340_v57 = vld [vmem:[%s4159_s4 + $0x38] sm:$0xff] }
 0x10c   : > { %1615 = vmatpush.msra.mxu0 %v606_v20  ;;  %2142 = vmatmul.msk.f32.gmra.mxu1 %vm655_vm0, %v3157_v7 }
 0x10d   : > { %2134 = vmatmul.msk.f32.gmra.mxu0 %vm655_vm0, %v3166_v24  ;;  %1295 = vmatpush.msra.mxu1 %v594_v14 }
 0x10e   : > { %1402 = vmatpush.msra.mxu2 %v595_v35  ;;  %1509 = vmatpush.msra.mxu3 %v596_v13 }
 0x10f   : > { %1616 = vmatpush.msra.mxu0 %v597_v49  ;;  %2151 = vmatmul.msk.f32.gmra.mxu2 %vm655_vm0, %v3183_v36 }
 0x110   : > { %1296 = vmatpush.msra.mxu1 %v585_v15  ;;  %1403 = vmatpush.msra.mxu2 %v586_v2 }
 0x111   : > { %1510 = vmatpush.msra.mxu3 %v587_v22  ;;  %1617 = vmatpush.msra.mxu0 %v588_v23 }
 0x112   : > { %2158 = vmatmul.msk.f32.gmra.mxu3 %vm655_vm0, %v3195_v38 }
 0x114   : > { %2143 = vmatmul.msk.f32.gmra.mxu1 %vm655_vm0, %v3200_v48 }
 0x115   : > { %2135 = vmatmul.msk.f32.gmra.mxu0 %vm655_vm0, %v3205_v11 }
 0x117   : > { %2152 = vmatmul.msk.f32.gmra.mxu2 %vm655_vm0, %v3214_v39 }
 0x11a   : > { %2159 = vmatmul.msk.f32.gmra.mxu3 %vm655_vm0, %v3223_v17 }
 0x11c   : > { %2144 = vmatmul.msk.f32.gmra.mxu1 %vm655_vm0, %v3228_v40 }
 0x11d   : > { %2136 = vmatmul.msk.f32.gmra.mxu0 %vm655_vm0, %v3233_v41 }
 0x11f   : > { %2153 = vmatmul.msk.f32.gmra.mxu2 %vm655_vm0, %v3242_v18 }
 0x122   : > { %2160 = vmatmul.msk.f32.gmra.mxu3 %vm655_vm0, %v3251_v42 }
 0x124   : > { %2145 = vmatmul.msk.f32.gmra.mxu1 %vm655_vm0, %v3256_v43 }
 0x125   : > { %2137 = vmatmul.msk.f32.gmra.mxu0 %vm655_vm0, %v3261_v44 }
 0x127   : > { %2154 = vmatmul.msk.f32.gmra.mxu2 %vm655_vm0, %v3270_v45 }
 0x12a   : > { %2161 = vmatmul.msk.f32.gmra.mxu3 %vm655_vm0, %v3279_v46 }
 0x12c   : > { %2146 = vmatmul.msk.f32.gmra.mxu1 %vm655_vm0, %v3284_v47 }
 0x12d   : > { %2138 = vmatmul.msk.f32.gmra.mxu0 %vm655_vm0, %v3289_v50 }
 0x12f   : > { %2155 = vmatmul.msk.f32.gmra.mxu2 %vm655_vm0, %v3298_v51 }
 0x132   : > { %2162 = vmatmul.msk.f32.gmra.mxu3 %vm655_vm0, %v3307_v52 }
 0x134   : > { %2147 = vmatmul.msk.f32.gmra.mxu1 %vm655_vm0, %v3312_v54 }
 0x135   : > { %2139 = vmatmul.msk.f32.gmra.mxu0 %vm655_vm0, %v3317_v53 }
 0x137   : > { %2156 = vmatmul.msk.f32.gmra.mxu2 %vm655_vm0, %v3326_v56 }
 0x13a   : > { %2223 = vmatmul.msk.f32.vlgmr.msrb.gmra.mxu3 %vm655_vm0, %v3085_v1 }
 0x13c   : > { %2148 = vmatmul.msk.f32.gmra.mxu1 %vm655_vm0, %v3335_v33 }
 0x13d   : > { %2140 = vmatmul.msk.f32.gmra.mxu0 %vm655_vm0, %v3340_v57 }
 0x13f   : > { %2193 = vmatmul.msk.f32.vlgmr.msrb.gmra.mxu2 %vm655_vm0, %v3085_v1 }
 0x142   : > { %2224 = vmatmul.msk.f32.gmra.mxu3 %vm655_vm0, %v3166_v24 }
 0x144   : > { %2163 = vmatmul.msk.f32.vlgmr.msrb.gmra.mxu1 %vm655_vm0, %v3085_v1 }
 0x145   : > { %2253 = vmatmul.msk.f32.vlgmr.msrb.gmra.mxu0 %vm655_vm0, %v3085_v1 }
 0x147   : > { %2194 = vmatmul.msk.f32.gmra.mxu2 %vm655_vm0, %v3166_v24 }
 0x14a   : > { %2225 = vmatmul.msk.f32.gmra.mxu3 %vm655_vm0, %v3205_v11 }
 0x14c   : > { %2164 = vmatmul.msk.f32.gmra.mxu1 %vm655_vm0, %v3166_v24 }
 0x14d   : > { %2254 = vmatmul.msk.f32.gmra.mxu0 %vm655_vm0, %v3166_v24 }
 0x14f   : > { %2195 = vmatmul.msk.f32.gmra.mxu2 %vm655_vm0, %v3205_v11 }
 0x152   : > { %2226 = vmatmul.msk.f32.gmra.mxu3 %vm655_vm0, %v3233_v41 }
 0x154   : > { %2165 = vmatmul.msk.f32.gmra.mxu1 %vm655_vm0, %v3205_v11 }
 0x155   : > { %2255 = vmatmul.msk.f32.gmra.mxu0 %vm655_vm0, %v3205_v11 }
 0x157   : > { %2196 = vmatmul.msk.f32.gmra.mxu2 %vm655_vm0, %v3233_v41 }
 0x15a   : > { %2227 = vmatmul.msk.f32.gmra.mxu3 %vm655_vm0, %v3261_v44 }
 0x15c   : > { %2166 = vmatmul.msk.f32.gmra.mxu1 %vm655_vm0, %v3233_v41 }
 0x15d   : > { %2256 = vmatmul.msk.f32.gmra.mxu0 %vm655_vm0, %v3233_v41 }
 0x15f   : > { %2197 = vmatmul.msk.f32.gmra.mxu2 %vm655_vm0, %v3261_v44 }
 0x162   : > { %2228 = vmatmul.msk.f32.gmra.mxu3 %vm655_vm0, %v3289_v50 }
 0x164   : > { %2167 = vmatmul.msk.f32.gmra.mxu1 %vm655_vm0, %v3261_v44 }
 0x165   : > { %2257 = vmatmul.msk.f32.gmra.mxu0 %vm655_vm0, %v3261_v44 }
 0x167   : > { %2198 = vmatmul.msk.f32.gmra.mxu2 %vm655_vm0, %v3289_v50 }
 0x16a   : > { %2229 = vmatmul.msk.f32.gmra.mxu3 %vm655_vm0, %v3317_v53 }
 0x16c   : > { %2168 = vmatmul.msk.f32.gmra.mxu1 %vm655_vm0, %v3289_v50 }
 0x16d   : > { %2258 = vmatmul.msk.f32.gmra.mxu0 %vm655_vm0, %v3289_v50 }
 0x16f   : > { %2199 = vmatmul.msk.f32.gmra.mxu2 %vm655_vm0, %v3317_v53 }
 0x172   : > { %2230 = vmatmul.msk.f32.gmra.mxu3 %vm655_vm0, %v3340_v57 }
 0x174   : > { %2169 = vmatmul.msk.f32.gmra.mxu1 %vm655_vm0, %v3317_v53 }
 0x175   : > { %2259 = vmatmul.msk.f32.gmra.mxu0 %vm655_vm0, %v3317_v53 }
 0x177   : > { %2200 = vmatmul.msk.f32.gmra.mxu2 %vm655_vm0, %v3340_v57 }
 0x17a   : > { %2231 = vmatmul.msk.f32.gmra.mxu3 %vm655_vm0, %v3077_v60 }
 0x17c   : > { %2170 = vmatmul.msk.f32.gmra.mxu1 %vm655_vm0, %v3340_v57 }
 0x17d   : > { %2260 = vmatmul.msk.f32.gmra.mxu0 %vm655_vm0, %v3340_v57  ;;  %v787_v59 = vpop.f32.mrf.mxu1  ;;  %v811_v58 = vpop.f32.mrf.mxu2 }
 0x17e   : > { %v763_v30 = vpop.f32.mrf.mxu0  ;;  %1781 = vst [vmem:[%s3413_s13 + $0x240] sm:$0xff] %v787_v59 }
 0x17f   : > { %2201 = vmatmul.msk.f32.gmra.mxu2 %vm655_vm0, %v3077_v60  ;;  %1709 = vst [vmem:[%s3413_s13] sm:$0xff] %v763_v30 }
 0x180   : > { %1853 = vst [vmem:[%s3413_s13 + $0x480] sm:$0xff] %v811_v58 }
 0x182   : > { %2232 = vmatmul.msk.f32.gmra.mxu3 %vm655_vm0, %v3157_v7 }
 0x184   : > { %2171 = vmatmul.msk.f32.gmra.mxu1 %vm655_vm0, %v3077_v60 }
 0x185   : > { %2261 = vmatmul.msk.f32.gmra.mxu0 %vm655_vm0, %v3077_v60 }
 0x186   : > { %v814_v61 = vpop.f32.mrf.mxu2 }
 0x187   : > { %2202 = vmatmul.msk.f32.gmra.mxu2 %vm655_vm0, %v3157_v7  ;;  %1862 = vst [vmem:[%s3413_s13 + $0x4c8] sm:$0xff] %v814_v61 }
 0x189   : > { %v790_v27 = vpop.f32.mrf.mxu1  ;;  %v835_v63 = vpop.f32.mrf.mxu3 }
 0x18a   : > { %v766_v0 = vpop.f32.mrf.mxu0  ;;  %1790 = vst [vmem:[%s3413_s13 + $0x288] sm:$0xff] %v790_v27  ;;  %2233 = vmatmul.msk.f32.gmra.mxu3 %vm655_vm0, %v3200_v48 }
 0x18b   : > { %1718 = vst [vmem:[%s3413_s13 + $0x48] sm:$0xff] %v766_v0 }
 0x18c   : > { %2172 = vmatmul.msk.f32.gmra.mxu1 %vm655_vm0, %v3157_v7  ;;  %1925 = vst [vmem:[%s3413_s13 + $0x6c0] sm:$0xff] %v835_v63 }
 0x18d   : > { %2262 = vmatmul.msk.f32.gmra.mxu0 %vm655_vm0, %v3157_v7 }
 0x18f   : > { %2203 = vmatmul.msk.f32.gmra.mxu2 %vm655_vm0, %v3200_v48 }
 0x191   : > { %v793_v60 = vpop.f32.mrf.mxu1 }
 0x192   : > { %v769_v3 = vpop.f32.mrf.mxu0  ;;  %1799 = vst [vmem:[%s3413_s13 + $0x2d0] sm:$0xff] %v793_v60  ;;  %v817_v5 = vpop.f32.mrf.mxu2  ;;  %2234 = vmatmul.msk.f32.gmra.mxu3 %vm655_vm0, %v3228_v40 }
 0x193   : > { %1727 = vst [vmem:[%s3413_s13 + $0x90] sm:$0xff] %v769_v3 }
 0x194   : > { %1871 = vst [vmem:[%s3413_s13 + $0x510] sm:$0xff] %v817_v5  ;;  %2173 = vmatmul.msk.f32.gmra.mxu1 %vm655_vm0, %v3200_v48 }
 0x195   : > { %2263 = vmatmul.msk.f32.gmra.mxu0 %vm655_vm0, %v3200_v48  ;;  %v838_v4 = vpop.f32.mrf.mxu3 }
 0x196   : > { %1934 = vst [vmem:[%s3413_s13 + $0x708] sm:$0xff] %v838_v4 }
 0x197   : > { %2204 = vmatmul.msk.f32.gmra.mxu2 %vm655_vm0, %v3228_v40 }
 0x199   : > { %v796_v6 = vpop.f32.mrf.mxu1 }
 0x19a   : > { %v772_v62 = vpop.f32.mrf.mxu0  ;;  %1808 = vst [vmem:[%s3413_s13 + $0x318] sm:$0xff] %v796_v6  ;;  %v820_v9 = vpop.f32.mrf.mxu2  ;;  %2235 = vmatmul.msk.f32.gmra.mxu3 %vm655_vm0, %v3256_v43 }
 0x19b   : > { %1736 = vst [vmem:[%s3413_s13 + $0xd8] sm:$0xff] %v772_v62 }
 0x19c   : > { %1880 = vst [vmem:[%s3413_s13 + $0x558] sm:$0xff] %v820_v9  ;;  %2174 = vmatmul.msk.f32.gmra.mxu1 %vm655_vm0, %v3228_v40 }
 0x19d   : > { %2264 = vmatmul.msk.f32.gmra.mxu0 %vm655_vm0, %v3228_v40  ;;  %v841_v10 = vpop.f32.mrf.mxu3 }
 0x19e   : > { %1943 = vst [vmem:[%s3413_s13 + $0x750] sm:$0xff] %v841_v10 }
 0x19f   : > { %2205 = vmatmul.msk.f32.gmra.mxu2 %vm655_vm0, %v3256_v43 }
 0x1a1   : > { %v799_v12 = vpop.f32.mrf.mxu1 }
 0x1a2   : > { %v775_v16 = vpop.f32.mrf.mxu0  ;;  %1817 = vst [vmem:[%s3413_s13 + $0x360] sm:$0xff] %v799_v12  ;;  %v823_v20 = vpop.f32.mrf.mxu2  ;;  %2236 = vmatmul.msk.f32.gmra.mxu3 %vm655_vm0, %v3284_v47 }
 0x1a3   : > { %1745 = vst [vmem:[%s3413_s13 + $0x120] sm:$0xff] %v775_v16 }
 0x1a4   : > { %1889 = vst [vmem:[%s3413_s13 + $0x5a0] sm:$0xff] %v823_v20  ;;  %2175 = vmatmul.msk.f32.gmra.mxu1 %vm655_vm0, %v3256_v43 }
 0x1a5   : > { %2265 = vmatmul.msk.f32.gmra.mxu0 %vm655_vm0, %v3256_v43  ;;  %v844_v26 = vpop.f32.mrf.mxu3 }
 0x1a6   : > { %1952 = vst [vmem:[%s3413_s13 + $0x798] sm:$0xff] %v844_v26 }
 0x1a7   : > { %2206 = vmatmul.msk.f32.gmra.mxu2 %vm655_vm0, %v3284_v47 }
 0x1a9   : > { %v802_v29 = vpop.f32.mrf.mxu1 }
 0x1aa   : > { %v778_v31 = vpop.f32.mrf.mxu0  ;;  %1826 = vst [vmem:[%s3413_s13 + $0x3a8] sm:$0xff] %v802_v29  ;;  %v826_v14 = vpop.f32.mrf.mxu2  ;;  %2237 = vmatmul.msk.f32.gmra.mxu3 %vm655_vm0, %v3312_v54 }
 0x1ab   : > { %1754 = vst [vmem:[%s3413_s13 + $0x168] sm:$0xff] %v778_v31 }
 0x1ac   : > { %1898 = vst [vmem:[%s3413_s13 + $0x5e8] sm:$0xff] %v826_v14  ;;  %2176 = vmatmul.msk.f32.gmra.mxu1 %vm655_vm0, %v3284_v47 }
 0x1ad   : > { %2266 = vmatmul.msk.f32.gmra.mxu0 %vm655_vm0, %v3284_v47  ;;  %v847_v25 = vpop.f32.mrf.mxu3 }
 0x1ae   : > { %1961 = vst [vmem:[%s3413_s13 + $0x7e0] sm:$0xff] %v847_v25 }
 0x1af   : > { %2207 = vmatmul.msk.f32.gmra.mxu2 %vm655_vm0, %v3312_v54 }
 0x1b1   : > { %v805_v28 = vpop.f32.mrf.mxu1 }
 0x1b2   : > { %v781_v32 = vpop.f32.mrf.mxu0  ;;  %1835 = vst [vmem:[%s3413_s13 + $0x3f0] sm:$0xff] %v805_v28  ;;  %v829_v34 = vpop.f32.mrf.mxu2  ;;  %2238 = vmatmul.msk.f32.gmra.mxu3 %vm655_vm0, %v3335_v33 }
 0x1b3   : > { %1763 = vst [vmem:[%s3413_s13 + $0x1b0] sm:$0xff] %v781_v32 }
 0x1b4   : > { %1907 = vst [vmem:[%s3413_s13 + $0x630] sm:$0xff] %v829_v34  ;;  %2177 = vmatmul.msk.f32.gmra.mxu1 %vm655_vm0, %v3312_v54 }
 0x1b5   : > { %2267 = vmatmul.msk.f32.gmra.mxu0 %vm655_vm0, %v3312_v54  ;;  %v850_v35 = vpop.f32.mrf.mxu3 }
 0x1b6   : > { %1970 = vst [vmem:[%s3413_s13 + $0x828] sm:$0xff] %v850_v35 }
 0x1b7   : > { %2208 = vmatmul.msk.f32.gmra.mxu2 %vm655_vm0, %v3335_v33 }
 0x1b9   : > { %v808_v13 = vpop.f32.mrf.mxu1 }
 0x1ba   : > { %v784_v55 = vpop.f32.mrf.mxu0  ;;  %1844 = vst [vmem:[%s3413_s13 + $0x438] sm:$0xff] %v808_v13  ;;  %v832_v37 = vpop.f32.mrf.mxu2  ;;  %2239 = vmatmul.msk.f32.gmra.mxu3 %vm655_vm0, %v3045_v19 }
 0x1bb   : > { %1772 = vst [vmem:[%s3413_s13 + $0x1f8] sm:$0xff] %v784_v55 }
 0x1bc   : > { %1916 = vst [vmem:[%s3413_s13 + $0x678] sm:$0xff] %v832_v37  ;;  %2178 = vmatmul.msk.f32.gmra.mxu1 %vm655_vm0, %v3335_v33 }
 0x1bd   : > { %2268 = vmatmul.msk.f32.gmra.mxu0 %vm655_vm0, %v3335_v33  ;;  %v1084_v49 = vpop.f32.mrf.mxu3 }
 0x1be   : > { %1712 = vst [vmem:[%s3413_s13 + $0x18] sm:$0xff] %v1084_v49 }
 0x1bf   : > { %2209 = vmatmul.msk.f32.gmra.mxu2 %vm655_vm0, %v3045_v19 }
 0x1c1   : > { %v870_v15 = vpop.f32.mrf.mxu1 }
 0x1c2   : > { %1710 = vst [vmem:[%s3413_s13 + $0x8] sm:$0xff] %v870_v15  ;;  %v977_v2 = vpop.f32.mrf.mxu2  ;;  %v1191_v22 = vpop.f32.mrf.mxu0  ;;  %2240 = vmatmul.msk.f32.gmra.mxu3 %vm655_vm0, %v3101_v21 }
 0x1c3   : > { %1711 = vst [vmem:[%s3413_s13 + $0x10] sm:$0xff] %v977_v2 }
 0x1c4   : > { %1713 = vst [vmem:[%s3413_s13 + $0x20] sm:$0xff] %v1191_v22  ;;  %2179 = vmatmul.msk.f32.gmra.mxu1 %vm655_vm0, %v3045_v19 }
 0x1c5   : > { %2269 = vmatmul.msk.f32.gmra.mxu0 %vm655_vm0, %v3045_v19  ;;  %v1087_v23 = vpop.f32.mrf.mxu3 }
 0x1c6   : > { %1721 = vst [vmem:[%s3413_s13 + $0x60] sm:$0xff] %v1087_v23 }
 0x1c7   : > { %2210 = vmatmul.msk.f32.gmra.mxu2 %vm655_vm0, %v3101_v21 }
 0x1c9   : > { %v873_v59 = vpop.f32.mrf.mxu1 }
 0x1ca   : > { %1719 = vst [vmem:[%s3413_s13 + $0x50] sm:$0xff] %v873_v59  ;;  %v980_v58 = vpop.f32.mrf.mxu2  ;;  %v1194_v30 = vpop.f32.mrf.mxu0  ;;  %2241 = vmatmul.msk.f32.gmra.mxu3 %vm655_vm0, %v3183_v36 }
 0x1cb   : > { %1720 = vst [vmem:[%s3413_s13 + $0x58] sm:$0xff] %v980_v58 }
 0x1cc   : > { %1722 = vst [vmem:[%s3413_s13 + $0x68] sm:$0xff] %v1194_v30  ;;  %2180 = vmatmul.msk.f32.gmra.mxu1 %vm655_vm0, %v3101_v21 }
 0x1cd   : > { %2270 = vmatmul.msk.f32.gmra.mxu0 %vm655_vm0, %v3101_v21  ;;  %v1090_v19 = vpop.f32.mrf.mxu3 }
 0x1ce   : > { %1730 = vst [vmem:[%s3413_s13 + $0xa8] sm:$0xff] %v1090_v19 }
 0x1cf   : > { %2211 = vmatmul.msk.f32.gmra.mxu2 %vm655_vm0, %v3183_v36 }
 0x1d1   : > { %v876_v61 = vpop.f32.mrf.mxu1 }
 0x1d2   : > { %1728 = vst [vmem:[%s3413_s13 + $0x98] sm:$0xff] %v876_v61  ;;  %v983_v27 = vpop.f32.mrf.mxu2  ;;  %v1197_v63 = vpop.f32.mrf.mxu0  ;;  %2242 = vmatmul.msk.f32.gmra.mxu3 %vm655_vm0, %v3214_v39 }
 0x1d3   : > { %1729 = vst [vmem:[%s3413_s13 + $0xa0] sm:$0xff] %v983_v27 }
 0x1d4   : > { %1731 = vst [vmem:[%s3413_s13 + $0xb0] sm:$0xff] %v1197_v63  ;;  %2181 = vmatmul.msk.f32.gmra.mxu1 %vm655_vm0, %v3183_v36 }
 0x1d5   : > { %2271 = vmatmul.msk.f32.gmra.mxu0 %vm655_vm0, %v3183_v36  ;;  %v1093_v21 = vpop.f32.mrf.mxu3 }
 0x1d6   : > { %1739 = vst [vmem:[%s3413_s13 + $0xf0] sm:$0xff] %v1093_v21 }
 0x1d7   : > { %2212 = vmatmul.msk.f32.gmra.mxu2 %vm655_vm0, %v3214_v39 }
 0x1d9   : > { %v879_v0 = vpop.f32.mrf.mxu1 }
 0x1da   : > { %1737 = vst [vmem:[%s3413_s13 + $0xe0] sm:$0xff] %v879_v0  ;;  %v986_v60 = vpop.f32.mrf.mxu2  ;;  %v1200_v3 = vpop.f32.mrf.mxu0  ;;  %2243 = vmatmul.msk.f32.gmra.mxu3 %vm655_vm0, %v3242_v18 }
 0x1db   : > { %1738 = vst [vmem:[%s3413_s13 + $0xe8] sm:$0xff] %v986_v60 }
 0x1dc   : > { %1740 = vst [vmem:[%s3413_s13 + $0xf8] sm:$0xff] %v1200_v3  ;;  %2182 = vmatmul.msk.f32.gmra.mxu1 %vm655_vm0, %v3214_v39 }
 0x1dd   : > { %2272 = vmatmul.msk.f32.gmra.mxu0 %vm655_vm0, %v3214_v39  ;;  %v1096_v36 = vpop.f32.mrf.mxu3 }
 0x1de   : > { %1748 = vst [vmem:[%s3413_s13 + $0x138] sm:$0xff] %v1096_v36 }
 0x1df   : > { %2213 = vmatmul.msk.f32.gmra.mxu2 %vm655_vm0, %v3242_v18 }
 0x1e1   : > { %v882_v5 = vpop.f32.mrf.mxu1 }
 0x1e2   : > { %1746 = vst [vmem:[%s3413_s13 + $0x128] sm:$0xff] %v882_v5  ;;  %v989_v4 = vpop.f32.mrf.mxu2  ;;  %v1203_v6 = vpop.f32.mrf.mxu0  ;;  %2244 = vmatmul.msk.f32.gmra.mxu3 %vm655_vm0, %v3270_v45 }
 0x1e3   : > { %1747 = vst [vmem:[%s3413_s13 + $0x130] sm:$0xff] %v989_v4 }
 0x1e4   : > { %1749 = vst [vmem:[%s3413_s13 + $0x140] sm:$0xff] %v1203_v6  ;;  %2183 = vmatmul.msk.f32.gmra.mxu1 %vm655_vm0, %v3242_v18 }
 0x1e5   : > { %2273 = vmatmul.msk.f32.gmra.mxu0 %vm655_vm0, %v3242_v18  ;;  %v1099_v39 = vpop.f32.mrf.mxu3 }
 0x1e6   : > { %1757 = vst [vmem:[%s3413_s13 + $0x180] sm:$0xff] %v1099_v39 }
 0x1e7   : > { %2214 = vmatmul.msk.f32.gmra.mxu2 %vm655_vm0, %v3270_v45 }
 0x1e9   : > { %v885_v62 = vpop.f32.mrf.mxu1 }
 0x1ea   : > { %1755 = vst [vmem:[%s3413_s13 + $0x170] sm:$0xff] %v885_v62  ;;  %v992_v9 = vpop.f32.mrf.mxu2  ;;  %v1206_v10 = vpop.f32.mrf.mxu0  ;;  %2245 = vmatmul.msk.f32.gmra.mxu3 %vm655_vm0, %v3298_v51 }
 0x1eb   : > { %1756 = vst [vmem:[%s3413_s13 + $0x178] sm:$0xff] %v992_v9 }
 0x1ec   : > { %1758 = vst [vmem:[%s3413_s13 + $0x188] sm:$0xff] %v1206_v10  ;;  %2184 = vmatmul.msk.f32.gmra.mxu1 %vm655_vm0, %v3270_v45 }
 0x1ed   : > { %2274 = vmatmul.msk.f32.gmra.mxu0 %vm655_vm0, %v3270_v45  ;;  %v1102_v18 = vpop.f32.mrf.mxu3 }
 0x1ee   : > { %1766 = vst [vmem:[%s3413_s13 + $0x1c8] sm:$0xff] %v1102_v18 }
 0x1ef   : > { %2215 = vmatmul.msk.f32.gmra.mxu2 %vm655_vm0, %v3298_v51 }
 0x1f1   : > { %v888_v12 = vpop.f32.mrf.mxu1 }
 0x1f2   : > { %1764 = vst [vmem:[%s3413_s13 + $0x1b8] sm:$0xff] %v888_v12  ;;  %v995_v16 = vpop.f32.mrf.mxu2  ;;  %v1209_v20 = vpop.f32.mrf.mxu0  ;;  %2246 = vmatmul.msk.f32.gmra.mxu3 %vm655_vm0, %v3326_v56 }
 0x1f3   : > { %1765 = vst [vmem:[%s3413_s13 + $0x1c0] sm:$0xff] %v995_v16 }
 0x1f4   : > { %1767 = vst [vmem:[%s3413_s13 + $0x1d0] sm:$0xff] %v1209_v20  ;;  %2185 = vmatmul.msk.f32.gmra.mxu1 %vm655_vm0, %v3298_v51 }
 0x1f5   : > { %2275 = vmatmul.msk.f32.gmra.mxu0 %vm655_vm0, %v3298_v51  ;;  %v1105_v45 = vpop.f32.mrf.mxu3 }
 0x1f6   : > { %1775 = vst [vmem:[%s3413_s13 + $0x210] sm:$0xff] %v1105_v45 }
 0x1f7   : > { %2216 = vmatmul.msk.f32.gmra.mxu2 %vm655_vm0, %v3326_v56 }
 0x1f9   : > { %v891_v26 = vpop.f32.mrf.mxu1 }
 0x1fa   : > { %1773 = vst [vmem:[%s3413_s13 + $0x200] sm:$0xff] %v891_v26  ;;  %v998_v29 = vpop.f32.mrf.mxu2  ;;  %v1212_v31 = vpop.f32.mrf.mxu0  ;;  %2247 = vmatmul.msk.f32.gmra.mxu3 %vm655_vm0, %v3127_v8 }
 0x1fb   : > { %1774 = vst [vmem:[%s3413_s13 + $0x208] sm:$0xff] %v998_v29 }
 0x1fc   : > { %1776 = vst [vmem:[%s3413_s13 + $0x218] sm:$0xff] %v1212_v31  ;;  %2186 = vmatmul.msk.f32.gmra.mxu1 %vm655_vm0, %v3326_v56 }
 0x1fd   : > { %2276 = vmatmul.msk.f32.gmra.mxu0 %vm655_vm0, %v3326_v56  ;;  %v1108_v51 = vpop.f32.mrf.mxu3 }
 0x1fe   : > { %1784 = vst [vmem:[%s3413_s13 + $0x258] sm:$0xff] %v1108_v51 }
 0x1ff   : > { %2217 = vmatmul.msk.f32.gmra.mxu2 %vm655_vm0, %v3127_v8 }
 0x201   : > { %v894_v14 = vpop.f32.mrf.mxu1 }
 0x202   : > { %1782 = vst [vmem:[%s3413_s13 + $0x248] sm:$0xff] %v894_v14  ;;  %v1001_v25 = vpop.f32.mrf.mxu2  ;;  %v1215_v28 = vpop.f32.mrf.mxu0  ;;  %2248 = vmatmul.msk.f32.gmra.mxu3 %vm655_vm0, %v3195_v38  ;;  %v2498_v14 = vld [vmem:[%s4159_s4 + $0x40] sm:$0xff] }
 0x203   : > { %1783 = vst [vmem:[%s3413_s13 + $0x250] sm:$0xff] %v1001_v25 }
 0x204   : > { %1785 = vst [vmem:[%s3413_s13 + $0x260] sm:$0xff] %v1215_v28  ;;  %2187 = vmatmul.msk.f32.gmra.mxu1 %vm655_vm0, %v3127_v8 }
 0x205   : > { %2277 = vmatmul.msk.f32.gmra.mxu0 %vm655_vm0, %v3127_v8  ;;  %v1111_v56 = vpop.f32.mrf.mxu3 }
 0x206   : > { %1793 = vst [vmem:[%s3413_s13 + $0x2a0] sm:$0xff] %v1111_v56 }
 0x207   : > { %2218 = vmatmul.msk.f32.gmra.mxu2 %vm655_vm0, %v3195_v38 }
 0x209   : > { %v897_v32 = vpop.f32.mrf.mxu1 }
 0x20a   : > { %1791 = vst [vmem:[%s3413_s13 + $0x290] sm:$0xff] %v897_v32  ;;  %v1004_v34 = vpop.f32.mrf.mxu2  ;;  %v1218_v35 = vpop.f32.mrf.mxu0  ;;  %2249 = vmatmul.msk.f32.gmra.mxu3 %vm655_vm0, %v3223_v17 }
 0x20b   : > { %1792 = vst [vmem:[%s3413_s13 + $0x298] sm:$0xff] %v1004_v34 }
 0x20c   : > { %1794 = vst [vmem:[%s3413_s13 + $0x2a8] sm:$0xff] %v1218_v35  ;;  %2188 = vmatmul.msk.f32.gmra.mxu1 %vm655_vm0, %v3195_v38 }
 0x20d   : > { %2278 = vmatmul.msk.f32.gmra.mxu0 %vm655_vm0, %v3195_v38  ;;  %v1114_v8 = vpop.f32.mrf.mxu3 }
 0x20e   : > { %1802 = vst [vmem:[%s3413_s13 + $0x2e8] sm:$0xff] %v1114_v8 }
 0x20f   : > { %2219 = vmatmul.msk.f32.gmra.mxu2 %vm655_vm0, %v3223_v17 }
 0x211   : > { %v900_v13 = vpop.f32.mrf.mxu1 }
 0x212   : > { %1800 = vst [vmem:[%s3413_s13 + $0x2d8] sm:$0xff] %v900_v13  ;;  %v1007_v55 = vpop.f32.mrf.mxu2  ;;  %v1221_v37 = vpop.f32.mrf.mxu0  ;;  %2250 = vmatmul.msk.f32.gmra.mxu3 %vm655_vm0, %v3251_v42 }
 0x213   : > { %1801 = vst [vmem:[%s3413_s13 + $0x2e0] sm:$0xff] %v1007_v55 }
 0x214   : > { %1803 = vst [vmem:[%s3413_s13 + $0x2f0] sm:$0xff] %v1221_v37  ;;  %2189 = vmatmul.msk.f32.gmra.mxu1 %vm655_vm0, %v3223_v17 }
 0x215   : > { %2279 = vmatmul.msk.f32.gmra.mxu0 %vm655_vm0, %v3223_v17  ;;  %v1117_v38 = vpop.f32.mrf.mxu3 }
 0x216   : > { %1811 = vst [vmem:[%s3413_s13 + $0x330] sm:$0xff] %v1117_v38 }
 0x217   : > { %2220 = vmatmul.msk.f32.gmra.mxu2 %vm655_vm0, %v3251_v42 }
 0x219   : > { %v903_v49 = vpop.f32.mrf.mxu1 }
 0x21a   : > { %1809 = vst [vmem:[%s3413_s13 + $0x320] sm:$0xff] %v903_v49  ;;  %v1010_v15 = vpop.f32.mrf.mxu2  ;;  %v1224_v2 = vpop.f32.mrf.mxu0  ;;  %2251 = vmatmul.msk.f32.gmra.mxu3 %vm655_vm0, %v3279_v46 }
 0x21b   : > { %1810 = vst [vmem:[%s3413_s13 + $0x328] sm:$0xff] %v1010_v15 }
 0x21c   : > { %1812 = vst [vmem:[%s3413_s13 + $0x338] sm:$0xff] %v1224_v2  ;;  %2190 = vmatmul.msk.f32.gmra.mxu1 %vm655_vm0, %v3251_v42 }
 0x21d   : > { %2280 = vmatmul.msk.f32.gmra.mxu0 %vm655_vm0, %v3251_v42  ;;  %v1120_v17 = vpop.f32.mrf.mxu3 }
 0x21e   : > { %1820 = vst [vmem:[%s3413_s13 + $0x378] sm:$0xff] %v1120_v17 }
 0x21f   : > { %2221 = vmatmul.msk.f32.gmra.mxu2 %vm655_vm0, %v3279_v46 }
 0x221   : > { %v906_v22 = vpop.f32.mrf.mxu1 }
 0x222   : > { %1818 = vst [vmem:[%s3413_s13 + $0x368] sm:$0xff] %v906_v22  ;;  %v1013_v23 = vpop.f32.mrf.mxu2  ;;  %v1227_v59 = vpop.f32.mrf.mxu0  ;;  %2252 = vmatmul.msk.f32.gmra.mxu3 %vm655_vm0, %v3307_v52 }
 0x223   : > { %1819 = vst [vmem:[%s3413_s13 + $0x370] sm:$0xff] %v1013_v23 }
 0x224   : > { %1821 = vst [vmem:[%s3413_s13 + $0x380] sm:$0xff] %v1227_v59  ;;  %2191 = vmatmul.msk.f32.gmra.mxu1 %vm655_vm0, %v3279_v46 }
 0x225   : > { %2281 = vmatmul.msk.f32.gmra.mxu0 %vm655_vm0, %v3279_v46  ;;  %v1123_v42 = vpop.f32.mrf.mxu3 }
 0x226   : > { %1829 = vst [vmem:[%s3413_s13 + $0x3c0] sm:$0xff] %v1123_v42 }
 0x227   : > { %2222 = vmatmul.msk.f32.gmra.mxu2 %vm655_vm0, %v3307_v52 }
 0x229   : > { %v909_v58 = vpop.f32.mrf.mxu1 }
 0x22a   : > { %1827 = vst [vmem:[%s3413_s13 + $0x3b0] sm:$0xff] %v909_v58  ;;  %v1016_v30 = vpop.f32.mrf.mxu2  ;;  %v1230_v19 = vpop.f32.mrf.mxu0  ;;  %2343 = vmatmul.msk.f32.vlgmr.msra.gmra.mxu3 %vm655_vm0, %v3085_v1 }
 0x22b   : > { %1828 = vst [vmem:[%s3413_s13 + $0x3b8] sm:$0xff] %v1016_v30 }
 0x22c   : > { %1830 = vst [vmem:[%s3413_s13 + $0x3c8] sm:$0xff] %v1230_v19  ;;  %2192 = vmatmul.msk.f32.gmra.mxu1 %vm655_vm0, %v3307_v52 }
 0x22d   : > { %2282 = vmatmul.msk.f32.gmra.mxu0 %vm655_vm0, %v3307_v52  ;;  %v1126_v46 = vpop.f32.mrf.mxu3 }
 0x22e   : > { %1838 = vst [vmem:[%s3413_s13 + $0x408] sm:$0xff] %v1126_v46 }
 0x22f   : > { %2313 = vmatmul.msk.f32.vlgmr.msra.gmra.mxu2 %vm655_vm0, %v3085_v1 }
 0x231   : > { %v912_v61 = vpop.f32.mrf.mxu1 }
 0x232   : > { %1836 = vst [vmem:[%s3413_s13 + $0x3f8] sm:$0xff] %v912_v61  ;;  %v1019_v27 = vpop.f32.mrf.mxu2  ;;  %v1233_v63 = vpop.f32.mrf.mxu0  ;;  %2344 = vmatmul.msk.f32.gmra.mxu3 %vm655_vm0, %v3166_v24 }
 0x233   : > { %1837 = vst [vmem:[%s3413_s13 + $0x400] sm:$0xff] %v1019_v27 }
 0x234   : > { %1839 = vst [vmem:[%s3413_s13 + $0x410] sm:$0xff] %v1233_v63  ;;  %2283 = vmatmul.msk.f32.vlgmr.msra.gmra.mxu1 %vm655_vm0, %v3085_v1  ;;  %v2499_v63 = vld [vmem:[%s4159_s4 + $0x80] sm:$0xff] }
 0x235   : > { %2373 = vmatmul.msk.f32.vlgmr.msra.gmra.mxu0 %vm655_vm0, %v3085_v1  ;;  %v1129_v52 = vpop.f32.mrf.mxu3 }
 0x236   : > { %1847 = vst [vmem:[%s3413_s13 + $0x450] sm:$0xff] %v1129_v52 }
 0x237   : > { %2314 = vmatmul.msk.f32.gmra.mxu2 %vm655_vm0, %v3166_v24 }
 0x239   : > { %v915_v21 = vpop.f32.mrf.mxu1 }
 0x23a   : > { %1845 = vst [vmem:[%s3413_s13 + $0x440] sm:$0xff] %v915_v21  ;;  %v1022_v0 = vpop.f32.mrf.mxu2  ;;  %v1236_v60 = vpop.f32.mrf.mxu0  ;;  %2345 = vmatmul.msk.f32.gmra.mxu3 %vm655_vm0, %v3205_v11 }
 0x23b   : > { %1846 = vst [vmem:[%s3413_s13 + $0x448] sm:$0xff] %v1022_v0 }
 0x23c   : > { %1848 = vst [vmem:[%s3413_s13 + $0x458] sm:$0xff] %v1236_v60  ;;  %2284 = vmatmul.msk.f32.gmra.mxu1 %vm655_vm0, %v3166_v24  ;;  %v2500_v60 = vld [vmem:[%s4159_s4 + $0x88] sm:$0xff] }
 0x23d   : > { %2374 = vmatmul.msk.f32.gmra.mxu0 %vm655_vm0, %v3166_v24  ;;  %v1132_v1 = vpop.f32.mrf.mxu3 }
 0x23e   : > { %1856 = vst [vmem:[%s3413_s13 + $0x498] sm:$0xff] %v1132_v1 }
 0x23f   : > { %2315 = vmatmul.msk.f32.gmra.mxu2 %vm655_vm0, %v3205_v11 }
 0x241   : > { %v918_v3 = vpop.f32.mrf.mxu1 }
 0x242   : > { %1854 = vst [vmem:[%s3413_s13 + $0x488] sm:$0xff] %v918_v3  ;;  %v1025_v36 = vpop.f32.mrf.mxu2  ;;  %v1239_v5 = vpop.f32.mrf.mxu0  ;;  %2346 = vmatmul.msk.f32.gmra.mxu3 %vm655_vm0, %v3233_v41 }
 0x243   : > { %1855 = vst [vmem:[%s3413_s13 + $0x490] sm:$0xff] %v1025_v36 }
 0x244   : > { %1857 = vst [vmem:[%s3413_s13 + $0x4a0] sm:$0xff] %v1239_v5  ;;  %2285 = vmatmul.msk.f32.gmra.mxu1 %vm655_vm0, %v3205_v11  ;;  %v2501_v5 = vld [vmem:[%s4159_s4 + $0x90] sm:$0xff] }
 0x245   : > { %2375 = vmatmul.msk.f32.gmra.mxu0 %vm655_vm0, %v3205_v11  ;;  %v1135_v24 = vpop.f32.mrf.mxu3 }
 0x246   : > { %1865 = vst [vmem:[%s3413_s13 + $0x4e0] sm:$0xff] %v1135_v24 }
 0x247   : > { %2316 = vmatmul.msk.f32.gmra.mxu2 %vm655_vm0, %v3233_v41 }
 0x249   : > { %v921_v4 = vpop.f32.mrf.mxu1 }
 0x24a   : > { %1863 = vst [vmem:[%s3413_s13 + $0x4d0] sm:$0xff] %v921_v4  ;;  %v1028_v6 = vpop.f32.mrf.mxu2  ;;  %v1242_v39 = vpop.f32.mrf.mxu0  ;;  %2347 = vmatmul.msk.f32.gmra.mxu3 %vm655_vm0, %v3261_v44 }
 0x24b   : > { %1864 = vst [vmem:[%s3413_s13 + $0x4d8] sm:$0xff] %v1028_v6 }
 0x24c   : > { %1866 = vst [vmem:[%s3413_s13 + $0x4e8] sm:$0xff] %v1242_v39  ;;  %2286 = vmatmul.msk.f32.gmra.mxu1 %vm655_vm0, %v3233_v41 }
 0x24d   : > { %2376 = vmatmul.msk.f32.gmra.mxu0 %vm655_vm0, %v3233_v41  ;;  %v1138_v11 = vpop.f32.mrf.mxu3 }
 0x24e   : > { %1874 = vst [vmem:[%s3413_s13 + $0x528] sm:$0xff] %v1138_v11  ;;  %v2502_v11 = vld [vmem:[%s4159_s4 + $0x98] sm:$0xff] }
 0x24f   : > { %2317 = vmatmul.msk.f32.gmra.mxu2 %vm655_vm0, %v3261_v44 }
 0x251   : > { %v924_v62 = vpop.f32.mrf.mxu1 }
 0x252   : > { %1872 = vst [vmem:[%s3413_s13 + $0x518] sm:$0xff] %v924_v62  ;;  %v1031_v9 = vpop.f32.mrf.mxu2  ;;  %v1245_v10 = vpop.f32.mrf.mxu0  ;;  %2348 = vmatmul.msk.f32.gmra.mxu3 %vm655_vm0, %v3289_v50 }
 0x253   : > { %1873 = vst [vmem:[%s3413_s13 + $0x520] sm:$0xff] %v1031_v9 }
 0x254   : > { %1875 = vst [vmem:[%s3413_s13 + $0x530] sm:$0xff] %v1245_v10  ;;  %2287 = vmatmul.msk.f32.gmra.mxu1 %vm655_vm0, %v3261_v44 }
 0x255   : > { %2377 = vmatmul.msk.f32.gmra.mxu0 %vm655_vm0, %v3261_v44  ;;  %v1141_v41 = vpop.f32.mrf.mxu3 }
 0x256   : > { %1883 = vst [vmem:[%s3413_s13 + $0x570] sm:$0xff] %v1141_v41 }
 0x257   : > { %2318 = vmatmul.msk.f32.gmra.mxu2 %vm655_vm0, %v3289_v50 }
 0x259   : > { %v927_v18 = vpop.f32.mrf.mxu1 }
 0x25a   : > { %1881 = vst [vmem:[%s3413_s13 + $0x560] sm:$0xff] %v927_v18  ;;  %v1034_v12 = vpop.f32.mrf.mxu2  ;;  %v1248_v16 = vpop.f32.mrf.mxu0  ;;  %2349 = vmatmul.msk.f32.gmra.mxu3 %vm655_vm0, %v3317_v53  ;;  %v2503_v18 = vld [vmem:[%s4159_s4 + $0xa0] sm:$0xff] }
 0x25b   : > { %1882 = vst [vmem:[%s3413_s13 + $0x568] sm:$0xff] %v1034_v12 }
 0x25c   : > { %1884 = vst [vmem:[%s3413_s13 + $0x578] sm:$0xff] %v1248_v16  ;;  %2288 = vmatmul.msk.f32.gmra.mxu1 %vm655_vm0, %v3289_v50 }
 0x25d   : > { %2378 = vmatmul.msk.f32.gmra.mxu0 %vm655_vm0, %v3289_v50  ;;  %v1144_v44 = vpop.f32.mrf.mxu3 }
 0x25e   : > { %1892 = vst [vmem:[%s3413_s13 + $0x5b8] sm:$0xff] %v1144_v44 }
 0x25f   : > { %2319 = vmatmul.msk.f32.gmra.mxu2 %vm655_vm0, %v3317_v53 }
 0x261   : > { %v930_v20 = vpop.f32.mrf.mxu1 }
 0x262   : > { %1890 = vst [vmem:[%s3413_s13 + $0x5a8] sm:$0xff] %v930_v20  ;;  %v1037_v45 = vpop.f32.mrf.mxu2  ;;  %v1251_v26 = vpop.f32.mrf.mxu0  ;;  %2350 = vmatmul.msk.f32.gmra.mxu3 %vm655_vm0, %v3340_v57 }
 0x263   : > { %1891 = vst [vmem:[%s3413_s13 + $0x5b0] sm:$0xff] %v1037_v45  ;;  %v2504_v45 = vld [vmem:[%s4159_s4 + $0xa8] sm:$0xff] }
 0x264   : > { %1893 = vst [vmem:[%s3413_s13 + $0x5c0] sm:$0xff] %v1251_v26  ;;  %2289 = vmatmul.msk.f32.gmra.mxu1 %vm655_vm0, %v3317_v53 }
 0x265   : > { %2379 = vmatmul.msk.f32.gmra.mxu0 %vm655_vm0, %v3317_v53  ;;  %v1147_v50 = vpop.f32.mrf.mxu3 }
 0x266   : > { %1901 = vst [vmem:[%s3413_s13 + $0x600] sm:$0xff] %v1147_v50 }
 0x267   : > { %2320 = vmatmul.msk.f32.gmra.mxu2 %vm655_vm0, %v3340_v57 }
 0x269   : > { %v933_v29 = vpop.f32.mrf.mxu1 }
 0x26a   : > { %1899 = vst [vmem:[%s3413_s13 + $0x5f0] sm:$0xff] %v933_v29  ;;  %v1040_v31 = vpop.f32.mrf.mxu2  ;;  %v1254_v51 = vpop.f32.mrf.mxu0  ;;  %2351 = vmatmul.msk.f32.gmra.mxu3 %vm655_vm0, %v2498_v14 }
 0x26b   : > { %1900 = vst [vmem:[%s3413_s13 + $0x5f8] sm:$0xff] %v1040_v31 }
 0x26c   : > { %1902 = vst [vmem:[%s3413_s13 + $0x608] sm:$0xff] %v1254_v51  ;;  %2290 = vmatmul.msk.f32.gmra.mxu1 %vm655_vm0, %v3340_v57  ;;  %v2505_v51 = vld [vmem:[%s4159_s4 + $0xb0] sm:$0xff] }
 0x26d   : > { %2380 = vmatmul.msk.f32.gmra.mxu0 %vm655_vm0, %v3340_v57  ;;  %v1150_v53 = vpop.f32.mrf.mxu3 }
 0x26e   : > { %1910 = vst [vmem:[%s3413_s13 + $0x648] sm:$0xff] %v1150_v53 }
 0x26f   : > { %2321 = vmatmul.msk.f32.gmra.mxu2 %vm655_vm0, %v2498_v14 }
 0x271   : > { %v936_v25 = vpop.f32.mrf.mxu1 }
 0x272   : > { %1908 = vst [vmem:[%s3413_s13 + $0x638] sm:$0xff] %v936_v25  ;;  %v1043_v28 = vpop.f32.mrf.mxu2  ;;  %v1257_v56 = vpop.f32.mrf.mxu0  ;;  %2352 = vmatmul.msk.f32.gmra.mxu3 %vm655_vm0, %v3157_v7 }
 0x273   : > { %1909 = vst [vmem:[%s3413_s13 + $0x640] sm:$0xff] %v1043_v28 }
 0x274   : > { %1911 = vst [vmem:[%s3413_s13 + $0x650] sm:$0xff] %v1257_v56  ;;  %2291 = vmatmul.msk.f32.gmra.mxu1 %vm655_vm0, %v2498_v14  ;;  %v2506_v56 = vld [vmem:[%s4159_s4 + $0xb8] sm:$0xff] }
 0x275   : > { %2381 = vmatmul.msk.f32.gmra.mxu0 %vm655_vm0, %v2498_v14  ;;  %v1153_v57 = vpop.f32.mrf.mxu3 }
 0x276   : > { %1919 = vst [vmem:[%s3413_s13 + $0x690] sm:$0xff] %v1153_v57 }
 0x277   : > { %2322 = vmatmul.msk.f32.gmra.mxu2 %vm655_vm0, %v3157_v7 }
 0x279   : > { %v939_v32 = vpop.f32.mrf.mxu1 }
 0x27a   : > { %1917 = vst [vmem:[%s3413_s13 + $0x680] sm:$0xff] %v939_v32  ;;  %v1046_v34 = vpop.f32.mrf.mxu2  ;;  %v1260_v35 = vpop.f32.mrf.mxu0  ;;  %2353 = vmatmul.msk.f32.gmra.mxu3 %vm655_vm0, %v3200_v48 }
 0x27b   : > { %1918 = vst [vmem:[%s3413_s13 + $0x688] sm:$0xff] %v1046_v34 }
 0x27c   : > { %1920 = vst [vmem:[%s3413_s13 + $0x698] sm:$0xff] %v1260_v35  ;;  %2292 = vmatmul.msk.f32.gmra.mxu1 %vm655_vm0, %v3157_v7 }
 0x27d   : > { %2382 = vmatmul.msk.f32.gmra.mxu0 %vm655_vm0, %v3157_v7  ;;  %v1156_v8 = vpop.f32.mrf.mxu3 }
 0x27e   : > { %1928 = vst [vmem:[%s3413_s13 + $0x6d8] sm:$0xff] %v1156_v8  ;;  %v2507_v8 = vld [vmem:[%s4159_s4 + $0xc0] sm:$0xff] }
 0x27f   : > { %2323 = vmatmul.msk.f32.gmra.mxu2 %vm655_vm0, %v3200_v48 }
 0x281   : > { %v942_v13 = vpop.f32.mrf.mxu1 }
 0x282   : > { %1926 = vst [vmem:[%s3413_s13 + $0x6c8] sm:$0xff] %v942_v13  ;;  %v1049_v55 = vpop.f32.mrf.mxu2  ;;  %v1263_v37 = vpop.f32.mrf.mxu0  ;;  %2354 = vmatmul.msk.f32.gmra.mxu3 %vm655_vm0, %v3228_v40 }
 0x283   : > { %1927 = vst [vmem:[%s3413_s13 + $0x6d0] sm:$0xff] %v1049_v55 }
 0x284   : > { %1929 = vst [vmem:[%s3413_s13 + $0x6e0] sm:$0xff] %v1263_v37  ;;  %2293 = vmatmul.msk.f32.gmra.mxu1 %vm655_vm0, %v3200_v48 }
 0x285   : > { %2383 = vmatmul.msk.f32.gmra.mxu0 %vm655_vm0, %v3200_v48  ;;  %v1159_v7 = vpop.f32.mrf.mxu3 }
 0x286   : > { %1937 = vst [vmem:[%s3413_s13 + $0x720] sm:$0xff] %v1159_v7 }
 0x287   : > { %2324 = vmatmul.msk.f32.gmra.mxu2 %vm655_vm0, %v3228_v40 }
 0x289   : > { %v945_v38 = vpop.f32.mrf.mxu1 }
 0x28a   : > { %1935 = vst [vmem:[%s3413_s13 + $0x710] sm:$0xff] %v945_v38  ;;  %v1052_v49 = vpop.f32.mrf.mxu2  ;;  %v1266_v15 = vpop.f32.mrf.mxu0  ;;  %2355 = vmatmul.msk.f32.gmra.mxu3 %vm655_vm0, %v3256_v43  ;;  %v2508_v38 = vld [vmem:[%s4159_s4 + $0xc8] sm:$0xff] }
 0x28b   : > { %1936 = vst [vmem:[%s3413_s13 + $0x718] sm:$0xff] %v1052_v49 }
 0x28c   : > { %1938 = vst [vmem:[%s3413_s13 + $0x728] sm:$0xff] %v1266_v15  ;;  %2294 = vmatmul.msk.f32.gmra.mxu1 %vm655_vm0, %v3228_v40 }
 0x28d   : > { %2384 = vmatmul.msk.f32.gmra.mxu0 %vm655_vm0, %v3228_v40  ;;  %v1162_v48 = vpop.f32.mrf.mxu3 }
 0x28e   : > { %1946 = vst [vmem:[%s3413_s13 + $0x768] sm:$0xff] %v1162_v48 }
 0x28f   : > { %2325 = vmatmul.msk.f32.gmra.mxu2 %vm655_vm0, %v3256_v43 }
 0x291   : > { %v948_v2 = vpop.f32.mrf.mxu1 }
 0x292   : > { %1944 = vst [vmem:[%s3413_s13 + $0x758] sm:$0xff] %v948_v2  ;;  %v1055_v17 = vpop.f32.mrf.mxu2  ;;  %v1269_v22 = vpop.f32.mrf.mxu0  ;;  %2356 = vmatmul.msk.f32.gmra.mxu3 %vm655_vm0, %v3284_v47 }
 0x293   : > { %1945 = vst [vmem:[%s3413_s13 + $0x760] sm:$0xff] %v1055_v17  ;;  %v2509_v17 = vld [vmem:[%s4159_s4 + $0xd0] sm:$0xff] }
 0x294   : > { %1947 = vst [vmem:[%s3413_s13 + $0x770] sm:$0xff] %v1269_v22  ;;  %2295 = vmatmul.msk.f32.gmra.mxu1 %vm655_vm0, %v3256_v43 }
 0x295   : > { %2385 = vmatmul.msk.f32.gmra.mxu0 %vm655_vm0, %v3256_v43  ;;  %v1165_v40 = vpop.f32.mrf.mxu3 }
 0x296   : > { %1955 = vst [vmem:[%s3413_s13 + $0x7b0] sm:$0xff] %v1165_v40 }
 0x297   : > { %2326 = vmatmul.msk.f32.gmra.mxu2 %vm655_vm0, %v3284_v47 }
 0x299   : > { %v951_v23 = vpop.f32.mrf.mxu1 }
 0x29a   : > { %1953 = vst [vmem:[%s3413_s13 + $0x7a0] sm:$0xff] %v951_v23  ;;  %v1058_v59 = vpop.f32.mrf.mxu2  ;;  %v1272_v42 = vpop.f32.mrf.mxu0  ;;  %2357 = vmatmul.msk.f32.gmra.mxu3 %vm655_vm0, %v3312_v54 }
 0x29b   : > { %1954 = vst [vmem:[%s3413_s13 + $0x7a8] sm:$0xff] %v1058_v59 }
 0x29c   : > { %1956 = vst [vmem:[%s3413_s13 + $0x7b8] sm:$0xff] %v1272_v42  ;;  %2296 = vmatmul.msk.f32.gmra.mxu1 %vm655_vm0, %v3284_v47  ;;  %v2510_v42 = vld [vmem:[%s4159_s4 + $0xd8] sm:$0xff] }
 0x29d   : > { %2386 = vmatmul.msk.f32.gmra.mxu0 %vm655_vm0, %v3284_v47  ;;  %v1168_v43 = vpop.f32.mrf.mxu3 }
 0x29e   : > { %1964 = vst [vmem:[%s3413_s13 + $0x7f8] sm:$0xff] %v1168_v43 }
 0x29f   : > { %2327 = vmatmul.msk.f32.gmra.mxu2 %vm655_vm0, %v3312_v54 }
 0x2a1   : > { %v954_v58 = vpop.f32.mrf.mxu1 }
 0x2a2   : > { %1962 = vst [vmem:[%s3413_s13 + $0x7e8] sm:$0xff] %v954_v58  ;;  %v1061_v30 = vpop.f32.mrf.mxu2  ;;  %v1275_v19 = vpop.f32.mrf.mxu0  ;;  %2358 = vmatmul.msk.f32.gmra.mxu3 %vm655_vm0, %v3335_v33 }
 0x2a3   : > { %1963 = vst [vmem:[%s3413_s13 + $0x7f0] sm:$0xff] %v1061_v30 }
 0x2a4   : > { %1965 = vst [vmem:[%s3413_s13 + $0x800] sm:$0xff] %v1275_v19  ;;  %2297 = vmatmul.msk.f32.gmra.mxu1 %vm655_vm0, %v3312_v54 }
 0x2a5   : > { %2387 = vmatmul.msk.f32.gmra.mxu0 %vm655_vm0, %v3312_v54  ;;  %v1171_v47 = vpop.f32.mrf.mxu3 }
 0x2a6   : > { %1973 = vst [vmem:[%s3413_s13 + $0x840] sm:$0xff] %v1171_v47  ;;  %v2511_v47 = vld [vmem:[%s4159_s4 + $0xe0] sm:$0xff] }
 0x2a7   : > { %2328 = vmatmul.msk.f32.gmra.mxu2 %vm655_vm0, %v3335_v33 }
 0x2a9   : > { %v957_v46 = vpop.f32.mrf.mxu1 }
 0x2aa   : > { %1971 = vst [vmem:[%s3413_s13 + $0x830] sm:$0xff] %v957_v46  ;;  %v1064_v61 = vpop.f32.mrf.mxu2  ;;  %v1278_v27 = vpop.f32.mrf.mxu0  ;;  %2359 = vmatmul.msk.f32.gmra.mxu3 %vm655_vm0, %v2499_v63 }
 0x2ab   : > { %1972 = vst [vmem:[%s3413_s13 + $0x838] sm:$0xff] %v1064_v61 }
 0x2ac   : > { %1974 = vst [vmem:[%s3413_s13 + $0x848] sm:$0xff] %v1278_v27  ;;  %2298 = vmatmul.msk.f32.gmra.mxu1 %vm655_vm0, %v3335_v33 }
 0x2ad   : > { %2388 = vmatmul.msk.f32.gmra.mxu0 %vm655_vm0, %v3335_v33  ;;  %v1512_v54 = vpop.f32.mrf.mxu3 }
 0x2ae   : > { %1716 = vst [vmem:[%s3413_s13 + $0x38] sm:$0xff] %v1512_v54  ;;  %v2512_v54 = vld [vmem:[%s4159_s4 + $0xe8] sm:$0xff] }
 0x2af   : > { %2329 = vmatmul.msk.f32.gmra.mxu2 %vm655_vm0, %v2499_v63 }
 0x2b1   : > { %v1298_v52 = vpop.f32.mrf.mxu1 }
 0x2b2   : > { %1714 = vst [vmem:[%s3413_s13 + $0x28] sm:$0xff] %v1298_v52  ;;  %v1405_v21 = vpop.f32.mrf.mxu2  ;;  %v1619_v0 = vpop.f32.mrf.mxu0  ;;  %2360 = vmatmul.msk.f32.gmra.mxu3 %vm655_vm0, %v2500_v60 }
 0x2b3   : > { %1715 = vst [vmem:[%s3413_s13 + $0x30] sm:$0xff] %v1405_v21 }
 0x2b4   : > { %1717 = vst [vmem:[%s3413_s13 + $0x40] sm:$0xff] %v1619_v0  ;;  %2299 = vmatmul.msk.f32.gmra.mxu1 %vm655_vm0, %v2499_v63 }
 0x2b5   : > { %2389 = vmatmul.msk.f32.gmra.mxu0 %vm655_vm0, %v2499_v63  ;;  %v1515_v33 = vpop.f32.mrf.mxu3 }
 0x2b6   : > { %1725 = vst [vmem:[%s3413_s13 + $0x80] sm:$0xff] %v1515_v33 }
 0x2b7   : > { %2330 = vmatmul.msk.f32.gmra.mxu2 %vm655_vm0, %v2500_v60 }
 0x2b9   : > { %v1301_v1 = vpop.f32.mrf.mxu1 }
 0x2ba   : > { %1723 = vst [vmem:[%s3413_s13 + $0x70] sm:$0xff] %v1301_v1  ;;  %v1408_v3 = vpop.f32.mrf.mxu2  ;;  %v1622_v36 = vpop.f32.mrf.mxu0  ;;  %2361 = vmatmul.msk.f32.gmra.mxu3 %vm655_vm0, %v2501_v5 }
 0x2bb   : > { %1724 = vst [vmem:[%s3413_s13 + $0x78] sm:$0xff] %v1408_v3 }
 0x2bc   : > { %1726 = vst [vmem:[%s3413_s13 + $0x88] sm:$0xff] %v1622_v36  ;;  %2300 = vmatmul.msk.f32.gmra.mxu1 %vm655_vm0, %v2500_v60 }
 0x2bd   : > { %2390 = vmatmul.msk.f32.gmra.mxu0 %vm655_vm0, %v2500_v60  ;;  %v1518_v24 = vpop.f32.mrf.mxu3 }
 0x2be   : > { %1734 = vst [vmem:[%s3413_s13 + $0xc8] sm:$0xff] %v1518_v24 }
 0x2bf   : > { %2331 = vmatmul.msk.f32.gmra.mxu2 %vm655_vm0, %v2501_v5 }
 0x2c1   : > { %v1304_v4 = vpop.f32.mrf.mxu1 }
 0x2c2   : > { %1732 = vst [vmem:[%s3413_s13 + $0xb8] sm:$0xff] %v1304_v4  ;;  %v1411_v6 = vpop.f32.mrf.mxu2  ;;  %v1625_v39 = vpop.f32.mrf.mxu0  ;;  %2362 = vmatmul.msk.f32.gmra.mxu3 %vm655_vm0, %v2502_v11 }
 0x2c3   : > { %1733 = vst [vmem:[%s3413_s13 + $0xc0] sm:$0xff] %v1411_v6 }
 0x2c4   : > { %1735 = vst [vmem:[%s3413_s13 + $0xd0] sm:$0xff] %v1625_v39  ;;  %2301 = vmatmul.msk.f32.gmra.mxu1 %vm655_vm0, %v2501_v5 }
 0x2c5   : > { %2391 = vmatmul.msk.f32.gmra.mxu0 %vm655_vm0, %v2501_v5  ;;  %v1521_v62 = vpop.f32.mrf.mxu3 }
 0x2c6   : > { %1743 = vst [vmem:[%s3413_s13 + $0x110] sm:$0xff] %v1521_v62 }
 0x2c7   : > { %2332 = vmatmul.msk.f32.gmra.mxu2 %vm655_vm0, %v2502_v11 }
 0x2c9   : > { %v1307_v9 = vpop.f32.mrf.mxu1 }
 0x2ca   : > { %1741 = vst [vmem:[%s3413_s13 + $0x100] sm:$0xff] %v1307_v9  ;;  %v1414_v10 = vpop.f32.mrf.mxu2  ;;  %v1628_v41 = vpop.f32.mrf.mxu0  ;;  %2363 = vmatmul.msk.f32.gmra.mxu3 %vm655_vm0, %v2503_v18 }
 0x2cb   : > { %1742 = vst [vmem:[%s3413_s13 + $0x108] sm:$0xff] %v1414_v10 }
 0x2cc   : > { %1744 = vst [vmem:[%s3413_s13 + $0x118] sm:$0xff] %v1628_v41  ;;  %2302 = vmatmul.msk.f32.gmra.mxu1 %vm655_vm0, %v2502_v11 }
 0x2cd   : > { %2392 = vmatmul.msk.f32.gmra.mxu0 %vm655_vm0, %v2502_v11  ;;  %v1524_v12 = vpop.f32.mrf.mxu3 }
 0x2ce   : > { %1752 = vst [vmem:[%s3413_s13 + $0x158] sm:$0xff] %v1524_v12 }
 0x2cf   : > { %2333 = vmatmul.msk.f32.gmra.mxu2 %vm655_vm0, %v2503_v18 }
 0x2d1   : > { %v1310_v16 = vpop.f32.mrf.mxu1 }
 0x2d2   : > { %1750 = vst [vmem:[%s3413_s13 + $0x148] sm:$0xff] %v1310_v16  ;;  %v1417_v44 = vpop.f32.mrf.mxu2  ;;  %v1631_v20 = vpop.f32.mrf.mxu0  ;;  %2364 = vmatmul.msk.f32.gmra.mxu3 %vm655_vm0, %v2504_v45 }
 0x2d3   : > { %1751 = vst [vmem:[%s3413_s13 + $0x150] sm:$0xff] %v1417_v44 }
 0x2d4   : > { %1753 = vst [vmem:[%s3413_s13 + $0x160] sm:$0xff] %v1631_v20  ;;  %2303 = vmatmul.msk.f32.gmra.mxu1 %vm655_vm0, %v2503_v18 }
 0x2d5   : > { %2393 = vmatmul.msk.f32.gmra.mxu0 %vm655_vm0, %v2503_v18  ;;  %v1527_v26 = vpop.f32.mrf.mxu3 }
 0x2d6   : > { %1761 = vst [vmem:[%s3413_s13 + $0x1a0] sm:$0xff] %v1527_v26 }
 0x2d7   : > { %2334 = vmatmul.msk.f32.gmra.mxu2 %vm655_vm0, %v2504_v45 }
 0x2d9   : > { %v1313_v50 = vpop.f32.mrf.mxu1 }
 0x2da   : > { %1759 = vst [vmem:[%s3413_s13 + $0x190] sm:$0xff] %v1313_v50  ;;  %v1420_v29 = vpop.f32.mrf.mxu2  ;;  %v1634_v31 = vpop.f32.mrf.mxu0  ;;  %2365 = vmatmul.msk.f32.gmra.mxu3 %vm655_vm0, %v2505_v51 }
 0x2db   : > { %1760 = vst [vmem:[%s3413_s13 + $0x198] sm:$0xff] %v1420_v29 }
 0x2dc   : > { %1762 = vst [vmem:[%s3413_s13 + $0x1a8] sm:$0xff] %v1634_v31  ;;  %2304 = vmatmul.msk.f32.gmra.mxu1 %vm655_vm0, %v2504_v45 }
 0x2dd   : > { %2394 = vmatmul.msk.f32.gmra.mxu0 %vm655_vm0, %v2504_v45  ;;  %v1530_v14 = vpop.f32.mrf.mxu3 }
 0x2de   : > { %1770 = vst [vmem:[%s3413_s13 + $0x1e8] sm:$0xff] %v1530_v14 }
 0x2df   : > { %2335 = vmatmul.msk.f32.gmra.mxu2 %vm655_vm0, %v2505_v51 }
 0x2e1   : > { %v1316_v53 = vpop.f32.mrf.mxu1 }
 0x2e2   : > { %1768 = vst [vmem:[%s3413_s13 + $0x1d8] sm:$0xff] %v1316_v53  ;;  %v1423_v25 = vpop.f32.mrf.mxu2  ;;  %v1637_v28 = vpop.f32.mrf.mxu0  ;;  %2366 = vmatmul.msk.f32.gmra.mxu3 %vm655_vm0, %v2506_v56 }
 0x2e3   : > { %1769 = vst [vmem:[%s3413_s13 + $0x1e0] sm:$0xff] %v1423_v25 }
 0x2e4   : > { %1771 = vst [vmem:[%s3413_s13 + $0x1f0] sm:$0xff] %v1637_v28  ;;  %2305 = vmatmul.msk.f32.gmra.mxu1 %vm655_vm0, %v2505_v51 }
 0x2e5   : > { %2395 = vmatmul.msk.f32.gmra.mxu0 %vm655_vm0, %v2505_v51  ;;  %v1533_v57 = vpop.f32.mrf.mxu3 }
 0x2e6   : > { %1779 = vst [vmem:[%s3413_s13 + $0x230] sm:$0xff] %v1533_v57 }
 0x2e7   : > { %2336 = vmatmul.msk.f32.gmra.mxu2 %vm655_vm0, %v2506_v56 }
 0x2e9   : > { %v1319_v32 = vpop.f32.mrf.mxu1 }
 0x2ea   : > { %1777 = vst [vmem:[%s3413_s13 + $0x220] sm:$0xff] %v1319_v32  ;;  %v1426_v34 = vpop.f32.mrf.mxu2  ;;  %v1640_v35 = vpop.f32.mrf.mxu0  ;;  %2367 = vmatmul.msk.f32.gmra.mxu3 %vm655_vm0, %v2507_v8 }
 0x2eb   : > { %1778 = vst [vmem:[%s3413_s13 + $0x228] sm:$0xff] %v1426_v34 }
 0x2ec   : > { %1780 = vst [vmem:[%s3413_s13 + $0x238] sm:$0xff] %v1640_v35  ;;  %2306 = vmatmul.msk.f32.gmra.mxu1 %vm655_vm0, %v2506_v56 }
 0x2ed   : > { %2396 = vmatmul.msk.f32.gmra.mxu0 %vm655_vm0, %v2506_v56  ;;  %v1536_v13 = vpop.f32.mrf.mxu3 }
 0x2ee   : > { %1788 = vst [vmem:[%s3413_s13 + $0x278] sm:$0xff] %v1536_v13 }
 0x2ef   : > { %2337 = vmatmul.msk.f32.gmra.mxu2 %vm655_vm0, %v2507_v8 }
 0x2f1   : > { %v1322_v55 = vpop.f32.mrf.mxu1 }
 0x2f2   : > { %1786 = vst [vmem:[%s3413_s13 + $0x268] sm:$0xff] %v1322_v55  ;;  %v1429_v37 = vpop.f32.mrf.mxu2  ;;  %v1643_v7 = vpop.f32.mrf.mxu0  ;;  %2368 = vmatmul.msk.f32.gmra.mxu3 %vm655_vm0, %v2508_v38 }
 0x2f3   : > { %1787 = vst [vmem:[%s3413_s13 + $0x270] sm:$0xff] %v1429_v37 }
 0x2f4   : > { %1789 = vst [vmem:[%s3413_s13 + $0x280] sm:$0xff] %v1643_v7  ;;  %2307 = vmatmul.msk.f32.gmra.mxu1 %vm655_vm0, %v2507_v8 }
 0x2f5   : > { %2397 = vmatmul.msk.f32.gmra.mxu0 %vm655_vm0, %v2507_v8  ;;  %v1539_v49 = vpop.f32.mrf.mxu3 }
 0x2f6   : > { %1797 = vst [vmem:[%s3413_s13 + $0x2c0] sm:$0xff] %v1539_v49 }
 0x2f7   : > { %2338 = vmatmul.msk.f32.gmra.mxu2 %vm655_vm0, %v2508_v38 }
 0x2f9   : > { %v1325_v15 = vpop.f32.mrf.mxu1 }
 0x2fa   : > { %1795 = vst [vmem:[%s3413_s13 + $0x2b0] sm:$0xff] %v1325_v15  ;;  %v1432_v48 = vpop.f32.mrf.mxu2  ;;  %v1646_v2 = vpop.f32.mrf.mxu0  ;;  %2369 = vmatmul.msk.f32.gmra.mxu3 %vm655_vm0, %v2509_v17 }
 0x2fb   : > { %1796 = vst [vmem:[%s3413_s13 + $0x2b8] sm:$0xff] %v1432_v48 }
 0x2fc   : > { %1798 = vst [vmem:[%s3413_s13 + $0x2c8] sm:$0xff] %v1646_v2  ;;  %2308 = vmatmul.msk.f32.gmra.mxu1 %vm655_vm0, %v2508_v38 }
 0x2fd   : > { %2398 = vmatmul.msk.f32.gmra.mxu0 %vm655_vm0, %v2508_v38  ;;  %v1542_v22 = vpop.f32.mrf.mxu3 }
 0x2fe   : > { %1806 = vst [vmem:[%s3413_s13 + $0x308] sm:$0xff] %v1542_v22 }
 0x2ff   : > { %2339 = vmatmul.msk.f32.gmra.mxu2 %vm655_vm0, %v2509_v17 }
 0x301   : > { %v1328_v40 = vpop.f32.mrf.mxu1 }
 0x302   : > { %1804 = vst [vmem:[%s3413_s13 + $0x2f8] sm:$0xff] %v1328_v40  ;;  %v1435_v23 = vpop.f32.mrf.mxu2  ;;  %v1649_v59 = vpop.f32.mrf.mxu0  ;;  %2370 = vmatmul.msk.f32.gmra.mxu3 %vm655_vm0, %v2510_v42 }
 0x303   : > { %1805 = vst [vmem:[%s3413_s13 + $0x300] sm:$0xff] %v1435_v23 }
 0x304   : > { %1807 = vst [vmem:[%s3413_s13 + $0x310] sm:$0xff] %v1649_v59  ;;  %2309 = vmatmul.msk.f32.gmra.mxu1 %vm655_vm0, %v2509_v17 }
 0x305   : > { %2399 = vmatmul.msk.f32.gmra.mxu0 %vm655_vm0, %v2509_v17  ;;  %v1545_v43 = vpop.f32.mrf.mxu3 }
 0x306   : > { %1815 = vst [vmem:[%s3413_s13 + $0x350] sm:$0xff] %v1545_v43 }
 0x307   : > { %2340 = vmatmul.msk.f32.gmra.mxu2 %vm655_vm0, %v2510_v42 }
 0x309   : > { %v1331_v58 = vpop.f32.mrf.mxu1 }
 0x30a   : > { %1813 = vst [vmem:[%s3413_s13 + $0x340] sm:$0xff] %v1331_v58  ;;  %v1438_v30 = vpop.f32.mrf.mxu2  ;;  %v1652_v19 = vpop.f32.mrf.mxu0  ;;  %2371 = vmatmul.msk.f32.gmra.mxu3 %vm655_vm0, %v2511_v47 }
 0x30b   : > { %1814 = vst [vmem:[%s3413_s13 + $0x348] sm:$0xff] %v1438_v30 }
 0x30c   : > { %1816 = vst [vmem:[%s3413_s13 + $0x358] sm:$0xff] %v1652_v19  ;;  %2310 = vmatmul.msk.f32.gmra.mxu1 %vm655_vm0, %v2510_v42 }
 0x30d   : > { %2400 = vmatmul.msk.f32.gmra.mxu0 %vm655_vm0, %v2510_v42  ;;  %v1548_v46 = vpop.f32.mrf.mxu3 }
 0x30e   : > { %1824 = vst [vmem:[%s3413_s13 + $0x398] sm:$0xff] %v1548_v46 }
 0x30f   : > { %2341 = vmatmul.msk.f32.gmra.mxu2 %vm655_vm0, %v2511_v47 }
 0x311   : > { %v1334_v61 = vpop.f32.mrf.mxu1 }
 0x312   : > { %1822 = vst [vmem:[%s3413_s13 + $0x388] sm:$0xff] %v1334_v61  ;;  %v1441_v27 = vpop.f32.mrf.mxu2  ;;  %v1655_v63 = vpop.f32.mrf.mxu0  ;;  %2372 = vmatmul.msk.f32.gmra.mxu3 %vm655_vm0, %v2512_v54 }
 0x313   : > { %1823 = vst [vmem:[%s3413_s13 + $0x390] sm:$0xff] %v1441_v27 }
 0x314   : > { %1825 = vst [vmem:[%s3413_s13 + $0x3a0] sm:$0xff] %v1655_v63  ;;  %2311 = vmatmul.msk.f32.gmra.mxu1 %vm655_vm0, %v2511_v47 }
 0x315   : > { %2401 = vmatmul.msk.f32.gmra.mxu0 %vm655_vm0, %v2511_v47  ;;  %v1551_v52 = vpop.f32.mrf.mxu3 }
 0x316   : > { %1833 = vst [vmem:[%s3413_s13 + $0x3e0] sm:$0xff] %v1551_v52 }
 0x317   : > { %2342 = vmatmul.msk.f32.gmra.mxu2 %vm655_vm0, %v2512_v54 }
 0x319   : > { %v1337_v21 = vpop.f32.mrf.mxu1 }
 0x31a   : > { %1831 = vst [vmem:[%s3413_s13 + $0x3d0] sm:$0xff] %v1337_v21  ;;  %v1444_v0 = vpop.f32.mrf.mxu2  ;;  %v1658_v60 = vpop.f32.mrf.mxu0 }
 0x31b   : > { %1832 = vst [vmem:[%s3413_s13 + $0x3d8] sm:$0xff] %v1444_v0 }
 0x31c   : > { %1834 = vst [vmem:[%s3413_s13 + $0x3e8] sm:$0xff] %v1658_v60  ;;  %2312 = vmatmul.msk.f32.gmra.mxu1 %vm655_vm0, %v2512_v54 }
 0x31d   : > { %2402 = vmatmul.msk.f32.gmra.mxu0 %vm655_vm0, %v2512_v54  ;;  %v1554_v33 = vpop.f32.mrf.mxu3 }
 0x31e   : > { %1842 = vst [vmem:[%s3413_s13 + $0x428] sm:$0xff] %v1554_v33 }
 0x321   : > { %v1340_v1 = vpop.f32.mrf.mxu1 }
 0x322   : > { %1840 = vst [vmem:[%s3413_s13 + $0x418] sm:$0xff] %v1340_v1  ;;  %v1447_v3 = vpop.f32.mrf.mxu2  ;;  %v1661_v36 = vpop.f32.mrf.mxu0 }
 0x323   : > { %1841 = vst [vmem:[%s3413_s13 + $0x420] sm:$0xff] %v1447_v3 }
 0x324   : > { %1843 = vst [vmem:[%s3413_s13 + $0x430] sm:$0xff] %v1661_v36 }
 0x325   : > { %v1557_v5 = vpop.f32.mrf.mxu3 }
 0x326   : > { %1851 = vst [vmem:[%s3413_s13 + $0x470] sm:$0xff] %v1557_v5 }
 0x329   : > { %v1343_v24 = vpop.f32.mrf.mxu1 }
 0x32a   : > { %1849 = vst [vmem:[%s3413_s13 + $0x460] sm:$0xff] %v1343_v24  ;;  %v1450_v4 = vpop.f32.mrf.mxu2  ;;  %v1664_v6 = vpop.f32.mrf.mxu0 }
 0x32b   : > { %1850 = vst [vmem:[%s3413_s13 + $0x468] sm:$0xff] %v1450_v4 }
 0x32c   : > { %1852 = vst [vmem:[%s3413_s13 + $0x478] sm:$0xff] %v1664_v6 }
 0x32d   : > { %v1560_v39 = vpop.f32.mrf.mxu3 }
 0x32e   : > { %1860 = vst [vmem:[%s3413_s13 + $0x4b8] sm:$0xff] %v1560_v39 }
 0x331   : > { %v1346_v11 = vpop.f32.mrf.mxu1 }
 0x332   : > { %1858 = vst [vmem:[%s3413_s13 + $0x4a8] sm:$0xff] %v1346_v11  ;;  %v1453_v62 = vpop.f32.mrf.mxu2  ;;  %v1667_v9 = vpop.f32.mrf.mxu0 }
 0x333   : > { %1859 = vst [vmem:[%s3413_s13 + $0x4b0] sm:$0xff] %v1453_v62 }
 0x334   : > { %1861 = vst [vmem:[%s3413_s13 + $0x4c0] sm:$0xff] %v1667_v9 }
 0x335   : > { %v1563_v10 = vpop.f32.mrf.mxu3 }
 0x336   : > { %1869 = vst [vmem:[%s3413_s13 + $0x500] sm:$0xff] %v1563_v10 }
 0x339   : > { %v1349_v41 = vpop.f32.mrf.mxu1 }
 0x33a   : > { %1867 = vst [vmem:[%s3413_s13 + $0x4f0] sm:$0xff] %v1349_v41  ;;  %v1456_v18 = vpop.f32.mrf.mxu2  ;;  %v1670_v12 = vpop.f32.mrf.mxu0 }
 0x33b   : > { %1868 = vst [vmem:[%s3413_s13 + $0x4f8] sm:$0xff] %v1456_v18 }
 0x33c   : > { %1870 = vst [vmem:[%s3413_s13 + $0x508] sm:$0xff] %v1670_v12 }
 0x33d   : > { %v1566_v16 = vpop.f32.mrf.mxu3 }
 0x33e   : > { %1878 = vst [vmem:[%s3413_s13 + $0x548] sm:$0xff] %v1566_v16 }
 0x341   : > { %v1352_v44 = vpop.f32.mrf.mxu1 }
 0x342   : > { %1876 = vst [vmem:[%s3413_s13 + $0x538] sm:$0xff] %v1352_v44  ;;  %v1459_v20 = vpop.f32.mrf.mxu2  ;;  %v1673_v45 = vpop.f32.mrf.mxu0 }
 0x343   : > { %1877 = vst [vmem:[%s3413_s13 + $0x540] sm:$0xff] %v1459_v20 }
 0x344   : > { %1879 = vst [vmem:[%s3413_s13 + $0x550] sm:$0xff] %v1673_v45 }
 0x345   : > { %v1569_v26 = vpop.f32.mrf.mxu3 }
 0x346   : > { %1887 = vst [vmem:[%s3413_s13 + $0x590] sm:$0xff] %v1569_v26 }
 0x349   : > { %v1355_v50 = vpop.f32.mrf.mxu1 }
 0x34a   : > { %1885 = vst [vmem:[%s3413_s13 + $0x580] sm:$0xff] %v1355_v50  ;;  %v1462_v29 = vpop.f32.mrf.mxu2  ;;  %v1676_v31 = vpop.f32.mrf.mxu0 }
 0x34b   : > { %1886 = vst [vmem:[%s3413_s13 + $0x588] sm:$0xff] %v1462_v29 }
 0x34c   : > { %1888 = vst [vmem:[%s3413_s13 + $0x598] sm:$0xff] %v1676_v31 }
 0x34d   : > { %v1572_v51 = vpop.f32.mrf.mxu3 }
 0x34e   : > { %1896 = vst [vmem:[%s3413_s13 + $0x5d8] sm:$0xff] %v1572_v51 }
 0x351   : > { %v1358_v14 = vpop.f32.mrf.mxu1 }
 0x352   : > { %1894 = vst [vmem:[%s3413_s13 + $0x5c8] sm:$0xff] %v1358_v14  ;;  %v1465_v53 = vpop.f32.mrf.mxu2  ;;  %v1679_v25 = vpop.f32.mrf.mxu0 }
 0x353   : > { %1895 = vst [vmem:[%s3413_s13 + $0x5d0] sm:$0xff] %v1465_v53 }
 0x354   : > { %1897 = vst [vmem:[%s3413_s13 + $0x5e0] sm:$0xff] %v1679_v25 }
 0x355   : > { %v1575_v28 = vpop.f32.mrf.mxu3 }
 0x356   : > { %1905 = vst [vmem:[%s3413_s13 + $0x620] sm:$0xff] %v1575_v28 }
 0x359   : > { %v1361_v56 = vpop.f32.mrf.mxu1 }
 0x35a   : > { %1903 = vst [vmem:[%s3413_s13 + $0x610] sm:$0xff] %v1361_v56  ;;  %v1468_v57 = vpop.f32.mrf.mxu2  ;;  %v1682_v32 = vpop.f32.mrf.mxu0 }
 0x35b   : > { %1904 = vst [vmem:[%s3413_s13 + $0x618] sm:$0xff] %v1468_v57 }
 0x35c   : > { %1906 = vst [vmem:[%s3413_s13 + $0x628] sm:$0xff] %v1682_v32 }
 0x35d   : > { %v1578_v34 = vpop.f32.mrf.mxu3 }
 0x35e   : > { %1914 = vst [vmem:[%s3413_s13 + $0x668] sm:$0xff] %v1578_v34 }
 0x361   : > { %v1364_v35 = vpop.f32.mrf.mxu1 }
 0x362   : > { %1912 = vst [vmem:[%s3413_s13 + $0x658] sm:$0xff] %v1364_v35  ;;  %v1471_v8 = vpop.f32.mrf.mxu2  ;;  %v1685_v13 = vpop.f32.mrf.mxu0 }
 0x363   : > { %1913 = vst [vmem:[%s3413_s13 + $0x660] sm:$0xff] %v1471_v8 }
 0x364   : > { %1915 = vst [vmem:[%s3413_s13 + $0x670] sm:$0xff] %v1685_v13 }
 0x365   : > { %v1581_v55 = vpop.f32.mrf.mxu3 }
 0x366   : > { %1923 = vst [vmem:[%s3413_s13 + $0x6b0] sm:$0xff] %v1581_v55 }
 0x369   : > { %v1367_v37 = vpop.f32.mrf.mxu1 }
 0x36a   : > { %1921 = vst [vmem:[%s3413_s13 + $0x6a0] sm:$0xff] %v1367_v37  ;;  %v1474_v7 = vpop.f32.mrf.mxu2  ;;  %v1688_v38 = vpop.f32.mrf.mxu0 }
 0x36b   : > { %1922 = vst [vmem:[%s3413_s13 + $0x6a8] sm:$0xff] %v1474_v7 }
 0x36c   : > { %1924 = vst [vmem:[%s3413_s13 + $0x6b8] sm:$0xff] %v1688_v38 }
 0x36d   : > { %v1584_v49 = vpop.f32.mrf.mxu3 }
 0x36e   : > { %1932 = vst [vmem:[%s3413_s13 + $0x6f8] sm:$0xff] %v1584_v49 }
 0x371   : > { %v1370_v15 = vpop.f32.mrf.mxu1 }
 0x372   : > { %1930 = vst [vmem:[%s3413_s13 + $0x6e8] sm:$0xff] %v1370_v15  ;;  %v1477_v48 = vpop.f32.mrf.mxu2  ;;  %v1691_v2 = vpop.f32.mrf.mxu0 }
 0x373   : > { %1931 = vst [vmem:[%s3413_s13 + $0x6f0] sm:$0xff] %v1477_v48 }
 0x374   : > { %1933 = vst [vmem:[%s3413_s13 + $0x700] sm:$0xff] %v1691_v2 }
 0x375   : > { %v1587_v17 = vpop.f32.mrf.mxu3 }
 0x376   : > { %1941 = vst [vmem:[%s3413_s13 + $0x740] sm:$0xff] %v1587_v17 }
 0x379   : > { %v1373_v22 = vpop.f32.mrf.mxu1 }
 0x37a   : > { %1939 = vst [vmem:[%s3413_s13 + $0x730] sm:$0xff] %v1373_v22  ;;  %v1480_v40 = vpop.f32.mrf.mxu2  ;;  %v1694_v23 = vpop.f32.mrf.mxu0 }
 0x37b   : > { %1940 = vst [vmem:[%s3413_s13 + $0x738] sm:$0xff] %v1480_v40 }
 0x37c   : > { %1942 = vst [vmem:[%s3413_s13 + $0x748] sm:$0xff] %v1694_v23 }
 0x37d   : > { %v1590_v59 = vpop.f32.mrf.mxu3 }
 0x37e   : > { %1950 = vst [vmem:[%s3413_s13 + $0x788] sm:$0xff] %v1590_v59 }
 0x381   : > { %v1376_v42 = vpop.f32.mrf.mxu1 }
 0x382   : > { %1948 = vst [vmem:[%s3413_s13 + $0x778] sm:$0xff] %v1376_v42  ;;  %v1483_v43 = vpop.f32.mrf.mxu2  ;;  %v1697_v58 = vpop.f32.mrf.mxu0 }
 0x383   : > { %1949 = vst [vmem:[%s3413_s13 + $0x780] sm:$0xff] %v1483_v43 }
 0x384   : > { %1951 = vst [vmem:[%s3413_s13 + $0x790] sm:$0xff] %v1697_v58 }
 0x385   : > { %v1593_v30 = vpop.f32.mrf.mxu3 }
 0x386   : > { %1959 = vst [vmem:[%s3413_s13 + $0x7d0] sm:$0xff] %v1593_v30 }
 0x389   : > { %v1379_v19 = vpop.f32.mrf.mxu1 }
 0x38a   : > { %1957 = vst [vmem:[%s3413_s13 + $0x7c0] sm:$0xff] %v1379_v19  ;;  %v1486_v47 = vpop.f32.mrf.mxu2  ;;  %v1700_v46 = vpop.f32.mrf.mxu0 }
 0x38b   : > { %1958 = vst [vmem:[%s3413_s13 + $0x7c8] sm:$0xff] %v1486_v47 }
 0x38c   : > { %1960 = vst [vmem:[%s3413_s13 + $0x7d8] sm:$0xff] %v1700_v46 }
 0x38d   : > { %v1596_v61 = vpop.f32.mrf.mxu3 }
 0x38e   : > { %1968 = vst [vmem:[%s3413_s13 + $0x818] sm:$0xff] %v1596_v61 }
 0x391   : > { %v1382_v27 = vpop.f32.mrf.mxu1 }
 0x392   : > { %1966 = vst [vmem:[%s3413_s13 + $0x808] sm:$0xff] %v1382_v27  ;;  %v1489_v63 = vpop.f32.mrf.mxu2  ;;  %v1703_v54 = vpop.f32.mrf.mxu0 }
 0x393   : > { %1967 = vst [vmem:[%s3413_s13 + $0x810] sm:$0xff] %v1489_v63 }
 0x394   : > { %1969 = vst [vmem:[%s3413_s13 + $0x820] sm:$0xff] %v1703_v54 }
 0x395   : > { %v1599_v52 = vpop.f32.mrf.mxu3 }
 0x396   : > { %1977 = vst [vmem:[%s3413_s13 + $0x860] sm:$0xff] %v1599_v52 }
 0x398   : > { %1986 = sbr.rel (!%p2781_p9) target bundleno = 962 (0x3c2), region = 52 }
 0x399   : > { %v1385_v21 = vpop.f32.mrf.mxu1 }
 0x39a   : > { %1975 = vst [vmem:[%s3413_s13 + $0x850] sm:$0xff] %v1385_v21  ;;  %v1492_v0 = vpop.f32.mrf.mxu2  ;;  %v1706_v60 = vpop.f32.mrf.mxu0 }
 0x39b   : > { %1976 = vst [vmem:[%s3413_s13 + $0x858] sm:$0xff] %v1492_v0 }
 0x39c   : > { %1978 = vst [vmem:[%s3413_s13 + $0x868] sm:$0xff] %v1706_v60 }
 0x39d   : > { %s4193_s28 = smov (!%p1989_p8, %s1988_s28), 9 }
 0x39e   : > { %s1991_s29 = smul.u32 240, %s4193_s28 }
 0x3a0   : > { %s1992_s11 = ssub.s32 2160, %s1991_s29 }
 0x3a1   : > { %s1993_s7 = sshll.u32 %s1992_s11, 4 }
 0x3a2   : > { %1994 = vsyncadd %s1980_s15, %s1993_s7  ;;  %p4093_p10 = scmp.ne.s32.totalorder %s1991_s29, 0  ;;  %s2412_s8 = smul.u32 72, %s2680_s21 }
 0x3a3   : > { %s2405_s17 = sshll.u32 %s4193_s28, 3  ;;  %s2002_s30 = sshll.u32 %s3413_s13, 4  ;;  %s4103_s30 = int_to_ptr.vmem [resolvable:$true] %s2002_s30 }
 0x3a4   : > { %s1999_s12 = scalar_lea.hbm %s4160_s5, %s2412_s8  ;;  %s4106_s16 = smul.u32 3840, %s4193_s28 }
 0x3a5   : > { %s2004_s14 = sshll.u32 %s1999_s12, 4  ;;  %s2591_s25 = sshra.s32 %s4103_s30, 4  ;;  %s4108_s14 = int_to_ptr.hbm [resolvable:$true] %s2004_s14  ;;  %s2592_s25 = int_to_ptr.vmem [resolvable:$true] %s2591_s25 }
 0x3a6   : > { %s2593_s21 = sshrl.u32 %s4106_s16, 4  ;;  %s2697_s29 = smov [#allocation7]  }
 0x3a7   : > { %s2629_s9 = sshll.u32 %s2593_s21, 4  ;;  %s2596_s13 = sadd.s32 1, %s2593_s21 }
 0x3a8   : > { %p2595_p9 = scmp.ne.s32.totalorder %s2629_s9, %s4106_s16  ;;  %s2602_s11 = scalar_lea.vmem %s2697_s29, 4320 }
 0x3aa   : > { %s4195_s13 = smov (!%p2595_p9, %s2596_s13), %s2593_s21 }
 0x3ab   : > { %s2598_s27 = scalar_lea.vmem %s2592_s25, %s4195_s13 }
 0x3ac   : > { %p2599_p4 = scmp.ne.s32.totalorder %s2592_s25, %s2598_s27  ;;  %p2604_p0 = scmp.lt.s32.totalorder %s2602_s11, %s2598_s27 }
 0x3ae   : > { %p2600_p12 = pnand %p2599_p4, %p4093_p10 }
 0x3b0   : > { %p2601_p13 = pneg %p2600_p12 }
 0x3b2   : > { %p2606_p1 = pnand %p2604_p0, %p2601_p13 }
 0x3b4   : > { %2609 = shalt.err (!%p2606_p1)
}
 0x3b5   : > { %s2610_s7 = sshra.s32 %s4108_s14, 4  ;;  %s2621_s12 = scalar_lea.hbm %s4160_s5, 6000  ;;  %s2611_s7 = int_to_ptr.hbm [resolvable:$true] %s2610_s7 }
 0x3b6   : > { %s2617_s8 = scalar_lea.hbm %s2611_s7, %s4195_s13  ;;  %p2622_p6 = scmp.lt.s32.totalorder %s2611_s7, %s4160_s5 }
 0x3b7   : > { %p2618_p2 = scmp.ne.s32.totalorder %s2611_s7, %s2617_s8  ;;  %p2623_p7 = scmp.lt.s32.totalorder %s2621_s12, %s2617_s8 }
 0x3b9   : > { %p2619_p3 = pnand %p2618_p2, %p4093_p10  ;;  %p2624_p8 = por %p2623_p7, %p2622_p6 }
 0x3bb   : > { %p2620_p5 = pneg %p2619_p3 }
 0x3bd   : > { %p2625_p9 = pnand %p2624_p8, %p2620_p5 }
 0x3bf   : > { %2628 = shalt.err (!%p2625_p9)
}
 0x3c0   : > { %s2698_s9 = smov 1152   ;;  %s2699_s13 = smov 3200  }
 0x3c1   : > { %2010 = dma.vmem_to_hbm [thread:$0]  (%p4093_p10), %s4103_s30, %s4106_s16, %s4108_s14, %s1980_s15, %s2698_s9, %s2699_s13, %s2405_s17  }
 0x3c2 PF: > { %p2439_p4 = scmp.ge.s32.totalorder %s2688_s23, 2  ;;  %s2019_s29 = sand.u32 1, %s2668_s18  }
 0x3c3   : > { %s2020_s11 = scalar_lea.sflag [#allocation4], %s2019_s29 }
 0x3c4   : > { %p2436_p12 = pnand %p2439_p4, %p2788_p11 }
 0x3c6   : > { %p2437_p13 = pneg %p2436_p12 }
 0x3c8   : > { %2663 = dma.done.wait (%p2437_p13), %s2020_s11, 34560  }
 0x3c9   : > { %2665 = vsyncadd (%p2437_p13), %s2020_s11, 4294932736  ;;  %s24_s23 = sadd.s32 1, %s2688_s23   ;;  %s4175_s10 = sld [smem:[#allocation12_spill]] }
 0x3ca   : > { %p21_p0 = scmp.ge.s32.totalorder %s24_s23, 5   ;;  %s4176_s15 = sld [smem:[#allocation11_spill]] }
 0x3cb   : > { %s4177_s18 = smov %s2672_s19  ;;  %s4178_s19 = smov %s2676_s20 }
 0x3cc   : > { %s4180_s21 = smov %s2684_s22  ;;  %23 = sbr.rel (!%p21_p0) target bundleno = 8 (0x8), region = 98 }
 0x3cf   : > { %s4179_s20 = smov %s4175_s10 }
 0x3d0   : > { %s4181_s22 = smov %s4176_s15 }
 0x3d1   :  { %2026 = vsyncpa [#allocation3], 1 }
 0x3d2   :  { %2028 = vsyncpa [#allocation3 + $0x1], 1 }
 0x3d3   :  { %2029 = vsyncpa [#allocation6], 1 }
 0x3d4   :  { %2031 = vsyncpa [#allocation6 + $0x1], 1 }
 0x3d5   :  { %2032 = vsyncpa [#allocation4], 1 }
 0x3d6   :  { %2034 = vsyncpa [#allocation4 + $0x1], 1 }

</bundles_post_ra>
